<compile_context>
chip_gen: v7x
topology: tpu7x:2x2x1
jax: 0.10.0
libtpu: 0.0.40
codegen_flags: <defaults>
</compile_context>

<pallas_src>
import math
import functools
import numpy as np

import jax
import jax.numpy as jnp
from jax import lax
from jax.experimental import pallas as pl
from jax.experimental.pallas import tpu as pltpu

EPS_LN = 1e-5
EPS_L2 = 1e-12
NEG_BIG = -1e30


# ----------------------------------------------------------------------------
# in-kernel helpers (traced inside the Pallas kernels)
# ----------------------------------------------------------------------------
def _layernorm(x, g, eps=EPS_LN, stable=False):
    # dalle2 LayerNorm: var(unbiased=False), learned gain only, no bias
    if stable:
        x = x / jnp.max(x, axis=-1, keepdims=True)
    mean = jnp.mean(x, axis=-1, keepdims=True)
    var = jnp.mean((x - mean) ** 2, axis=-1, keepdims=True)
    return (x - mean) * lax.rsqrt(var + eps) * g


def _l2norm(x):
    # F.normalize(x, dim=-1)
    ss = jnp.sum(x * x, axis=-1, keepdims=True)
    return x * lax.rsqrt(jnp.maximum(ss, EPS_L2 * EPS_L2))


# ----------------------------------------------------------------------------
# fused per-layer kernel: pre-LN cosine-sim attention (+res) then SwiGLU FF (+res)
# grid = (batch, query_tile)
# ----------------------------------------------------------------------------
def _layer_kernel(xq_ref, xf_ref,
                  g1_ref, wq_ref, wkv_ref, nk_ref, nv_ref, wo3_ref, g2_ref,
                  cosq_ref, sinq_ref, cosk_ref, sink_ref, bias_ref,
                  g3_ref, w1_ref, w2_ref,
                  o_ref, *, heads, dim_head, scale, causal):
    f32, bf16 = jnp.float32, jnp.bfloat16
    dh = dim_head
    hdh = heads * dh

    xq = xq_ref[0]                                   # (TQ, D) queries / residual
    xf = xf_ref[0]                                   # (N, D)  full sequence for K/V
    tq = xq.shape[0]
    n = xf.shape[0]

    # ---------------- attention: keys / values from the full sequence --------
    xfn = _layernorm(xf, g1_ref[...]).astype(bf16)
    kv = jnp.dot(xfn, wkv_ref[...], preferred_element_type=f32)       # (N, 3*dh)
    k = kv[:, :dh] * cosk_ref[...] + kv[:, dh:2 * dh] * sink_ref[...]  # rotary
    v = kv[:, 2 * dh:]
    # learned null key/value prepended as key 0 (no rotary), as in the reference
    k = jnp.concatenate([nk_ref[...], k], axis=0)                     # (N+1, dh)
    v = jnp.concatenate([nv_ref[...], v], axis=0)                     # (N+1, dh)
    kn = _l2norm(k)                                                   # cosine-sim keys

    # ---------------- queries from this tile ---------------------------------
    xqn = _layernorm(xq, g1_ref[...]).astype(bf16)
    qall = jnp.dot(xqn, wq_ref[...], preferred_element_type=f32)      # (TQ, 2*H*dh)
    q = qall[:, :hdh] * cosq_ref[...] + qall[:, hdh:] * sinq_ref[...]  # rotary
    # head split (the single head<->lane move); rows ordered h*TQ + i
    q2 = jnp.concatenate([q[:, h * dh:(h + 1) * dh] for h in range(heads)], axis=0)
    q2 = _l2norm(q2) * scale                                          # scale folded on q

    sim = lax.dot_general(q2.astype(bf16), kn.astype(bf16),
                          (((1,), (1,)), ((), ())),
                          preferred_element_type=f32)                 # (H*TQ, N+1)
    sim = sim.reshape(heads, tq, n + 1) + bias_ref[...].astype(f32)   # T5 rel-pos bias

    if causal:
        # key j (0 = null) is masked for global query row i iff j >= i + 2
        q_glob = (lax.broadcasted_iota(jnp.int32, (heads, tq, n + 1), 1)
                  + pl.program_id(1) * tq)
        k_idx = lax.broadcasted_iota(jnp.int32, (heads, tq, n + 1), 2)
        sim = jnp.where(k_idx > q_glob + 1, NEG_BIG, sim)

    # softmax (f32 statistics; exp kept f32 for v5e compatibility)
    m = jnp.max(sim, axis=-1, keepdims=True)
    p = jnp.exp(sim - m)
    denom = jnp.sum(p, axis=-1, keepdims=True)

    pv = jnp.dot(p.reshape(heads * tq, n + 1).astype(bf16), v.astype(bf16),
                 preferred_element_type=f32)                          # (H*TQ, dh)
    pv = pv * pl.reciprocal(denom.reshape(heads * tq, 1), approx=True)

    # output projection: batched (per-head) matmul + head sum -> no lane stores
    ctx = lax.dot_general(pv.reshape(heads, tq, dh).astype(bf16), wo3_ref[...],
                          (((2,), (1,)), ((0,), (0,))),
                          preferred_element_type=f32)                 # (H, TQ, D)
    attn = jnp.sum(ctx, axis=0)                                       # (TQ, D)
    x1 = xq + _layernorm(attn, g2_ref[...])                           # to_out LN + residual

    # ---------------- feed-forward (SwiGLU) ----------------------------------
    yn = _layernorm(x1, g3_ref[...]).astype(bf16)
    h12 = jnp.dot(yn, w1_ref[...], preferred_element_type=f32)        # (TQ, 2F)
    fi = w1_ref.shape[1] // 2
    a, gate = h12[:, :fi], h12[:, fi:]
    hsw = a * (gate * jax.nn.sigmoid(gate))                           # x * silu(gate)
    ff = jnp.dot(hsw.astype(bf16), w2_ref[...], preferred_element_type=f32)
    o_ref[0] = x1 + ff


# ----------------------------------------------------------------------------
# final stable LayerNorm + projection, row-tiled over (B*N, D)
# ----------------------------------------------------------------------------
def _final_kernel(x_ref, g_ref, w_ref, o_ref):
    xn = _layernorm(x_ref[...], g_ref[...], stable=True)
    o_ref[...] = jnp.dot(xn.astype(jnp.bfloat16), w_ref[...],
                         preferred_element_type=jnp.float32)


# ----------------------------------------------------------------------------
# BlockSpec helpers
# ----------------------------------------------------------------------------
def _const_spec(shape, ngrid):
    """Full-array spec with a constant index map; single-buffered if supported."""
    nd = len(shape)
    if ngrid == 1:
        idx = lambda i, _nd=nd: (0,) * _nd
    else:
        idx = lambda i, j, _nd=nd: (0,) * _nd
    if hasattr(pl, "Buffered"):
        try:
            return pl.BlockSpec(shape, idx, pipeline_mode=pl.Buffered(1))
        except TypeError:          # older jax without pipeline_mode kwarg
            pass
    return pl.BlockSpec(shape, idx)


# ----------------------------------------------------------------------------
# pallas_call wrappers
# ----------------------------------------------------------------------------
def layer_block(x, lw, cosq, sinq, cosk, sink, bias, *,
                heads, dim_head, scale, causal, q_tile):
    B, N, D = x.shape
    n_qt = N // q_tile
    kernel = functools.partial(_layer_kernel, heads=heads, dim_head=dim_head,
                               scale=scale, causal=causal)
    operands = (x, x,
                lw['g_ln'], lw['w_q'], lw['w_kv'], lw['nk'], lw['nv'],
                lw['wo3'], lw['g_out'],
                cosq, sinq, cosk, sink, bias,
                lw['g_ff'], lw['w1'], lw['w2'])
    in_specs = [
        pl.BlockSpec((1, q_tile, D), lambda b, q: (b, q, 0)),           # x (query tile)
        pl.BlockSpec((1, N, D), lambda b, q: (b, 0, 0)),                # x (full, for K/V)
        _const_spec(lw['g_ln'].shape, 2),
        _const_spec(lw['w_q'].shape, 2),
        _const_spec(lw['w_kv'].shape, 2),
        _const_spec(lw['nk'].shape, 2),
        _const_spec(lw['nv'].shape, 2),
        _const_spec(lw['wo3'].shape, 2),
        _const_spec(lw['g_out'].shape, 2),
        pl.BlockSpec((q_tile, heads * dim_head), lambda b, q: (q, 0)),  # cos (q)
        pl.BlockSpec((q_tile, heads * dim_head), lambda b, q: (q, 0)),  # sin (q)
        _const_spec(cosk.shape, 2),
        _const_spec(sink.shape, 2),
        pl.BlockSpec((heads, q_tile, N + 1), lambda b, q: (0, q, 0)),   # rel-pos bias
        _const_spec(lw['g_ff'].shape, 2),
        _const_spec(lw['w1'].shape, 2),
        _const_spec(lw['w2'].shape, 2),
    ]
    return pl.pallas_call(
        kernel,
        out_shape=jax.ShapeDtypeStruct((B, N, D), jnp.float32),
        grid=(B, n_qt),
        in_specs=in_specs,
        out_specs=pl.BlockSpec((1, q_tile, D), lambda b, q: (b, q, 0)),
        compiler_params=pltpu.CompilerParams(
            dimension_semantics=("parallel", "parallel")),
    )(*operands)


def final_block(x, g_final, w_proj):
    B, N, D = x.shape
    BN = B * N
    x2 = x.reshape(BN, D)
    tile = BN
    for t in (1024, 512, 256, 128, 64, 32, 16, 8):
        if t <= BN and BN % t == 0:
            tile = t
            break
    out = pl.pallas_call(
        _final_kernel,
        out_shape=jax.ShapeDtypeStruct((BN, D), jnp.float32),
        grid=(BN // tile,),
        in_specs=[pl.BlockSpec((tile, D), lambda i: (i, 0)),
                  _const_spec(g_final.shape, 1),
                  _const_spec(w_proj.shape, 1)],
        out_specs=pl.BlockSpec((tile, D), lambda i: (i, 0)),
        compiler_params=pltpu.CompilerParams(dimension_semantics=("parallel",)),
    )(x2, g_final, w_proj)
    return out.reshape(B, N, D)


# ----------------------------------------------------------------------------
# host-side glue: rel-pos bias, rotary tables, weight packing, init
# ----------------------------------------------------------------------------
def compute_attn_bias(emb, n, heads, num_buckets=32, max_distance=128):
    # dalle2 RelPosBias(n, n+1): q_pos = arange(n), k_pos = arange(n+1) (key 0 = null kv)
    q_pos = jnp.arange(n)
    k_pos = jnp.arange(n + 1)
    rel = k_pos[None, :] - q_pos[:, None]
    neg = jnp.maximum(-rel, 0)
    max_exact = num_buckets // 2
    is_small = neg < max_exact
    nf = jnp.maximum(neg, 1).astype(jnp.float32)
    val_if_large = max_exact + (jnp.log(nf / max_exact) /
                                math.log(max_distance / max_exact) *
                                (num_buckets - max_exact)).astype(jnp.int32)
    val_if_large = jnp.minimum(val_if_large, num_buckets - 1)
    bucket = jnp.where(is_small, neg, val_if_large)
    values = emb[bucket]                               # (n, n+1, heads)
    return jnp.transpose(values, (2, 0, 1)).astype(jnp.bfloat16)   # (heads, n, n+1)


def rotary_tables(n, dim_head):
    # rotary-embedding-torch, interleaved pairs, rot_dim = min(32, dim_head)
    rot_dim = min(32, dim_head)
    inv_freq = 1.0 / (10000.0 ** (np.arange(0, rot_dim, 2, dtype=np.float32) / rot_dim))
    t = np.arange(n, dtype=np.float32)
    freqs = np.repeat(np.einsum('i,j->ij', t, inv_freq), 2, axis=-1)
    cos = np.concatenate([np.cos(freqs),
                          np.ones((n, dim_head - rot_dim), np.float32)], axis=-1)
    sin = np.concatenate([np.sin(freqs),
                          np.zeros((n, dim_head - rot_dim), np.float32)], axis=-1)
    return jnp.asarray(cos), jnp.asarray(sin)


def _rotate_half_matrix(dim_head):
    rot_dim = min(32, dim_head)
    rot = np.zeros((dim_head, dim_head), np.float32)
    for i in range(rot_dim // 2):
        rot[2 * i + 1, 2 * i] = -1.0
        rot[2 * i, 2 * i + 1] = 1.0
    return jnp.asarray(rot)


def _fold_rotate_half(w, rot, heads, dim_head):
    # rotate_half(x @ w) == x @ _fold_rotate_half(w)  (rot is +-1/0, exact)
    d = w.shape[0]
    w3 = w.astype(jnp.float32).reshape(d, heads, dim_head)
    return jnp.einsum('dhk,kj->dhj', w3, rot).reshape(d, heads * dim_head)


def prepare_weights(params, *, heads, dim_head):
    """Pack per-layer weights into wide bf16 MXU operands (done once per forward)."""
    rot = _rotate_half_matrix(dim_head)
    layers = []
    for layer in params['layers']:
        ap, fp = layer['attn'], layer['ff']
        wq = ap['wq'].astype(jnp.float32)
        wk = ap['wk'].astype(jnp.float32)
        wv = ap['wv'].astype(jnp.float32)
        w_q = jnp.concatenate([wq, _fold_rotate_half(wq, rot, heads, dim_head)],
                              axis=1).astype(jnp.bfloat16)             # (D, 2*H*dh)
        w_kv = jnp.concatenate([wk, _fold_rotate_half(wk, rot, 1, dim_head), wv],
                               axis=1).astype(jnp.bfloat16)            # (D, 3*dh)
        layers.append({
            'g_ln': ap['g_ln'],
            'w_q': w_q,
            'w_kv': w_kv,
            'nk': ap['nk'].astype(jnp.float32),
            'nv': ap['nv'].astype(jnp.float32),
            'wo3': ap['wo'].astype(jnp.bfloat16).reshape(heads, dim_head, -1),
            'g_out': ap['g_out'],
            'g_ff': fp['g_ln'],
            'w1': jnp.concatenate([fp['w1a'], fp['w1b']], axis=1).astype(jnp.bfloat16),
            'w2': fp['w2'].astype(jnp.bfloat16),
        })
    return {'layers': layers,
            'g_final': params['g_final'],
            'w_proj': params['w_proj'].astype(jnp.bfloat16)}


def init_params(key, *, dim, depth, heads, dim_head, ff_mult, num_buckets=32):
    inner_attn = heads * dim_head
    inner_ff = dim * ff_mult
    keys = iter(jax.random.split(key, 4 + depth * 12))

    def nrm(shape, scale):
        return jax.random.normal(next(keys), shape, jnp.float32) * scale

    params = {
        'rel_emb': nrm((num_buckets, heads), 0.02),
        'g_final': jnp.ones((1, dim), jnp.float32),
        'w_proj': nrm((dim, dim), dim ** -0.5),
        'layers': [],
    }
    for _ in range(depth):
        attn = {
            'g_ln': jnp.ones((1, dim), jnp.float32),
            'wq': nrm((dim, inner_attn), dim ** -0.5),
            'wk': nrm((dim, dim_head), dim ** -0.5),
            'wv': nrm((dim, dim_head), dim ** -0.5),
            'nk': nrm((1, dim_head), 1.0),
            'nv': nrm((1, dim_head), 1.0),
            'wo': nrm((inner_attn, dim), inner_attn ** -0.5),
            'g_out': jnp.ones((1, dim), jnp.float32),
        }
        ff = {
            'g_ln': jnp.ones((1, dim), jnp.float32),
            'w1a': nrm((dim, inner_ff), dim ** -0.5),
            'w1b': nrm((dim, inner_ff), dim ** -0.5),
            'w2': nrm((inner_ff, dim), inner_ff ** -0.5),
        }
        params['layers'].append({'attn': attn, 'ff': ff})
    return params


def flagged_causal_transformer(x, params, *, heads, dim_head, causal=True,
                               cosine_sim_scale=16.0, q_tile=None):
    B, N, D = x.shape
    x = x.astype(jnp.float32)                  # init_norm = Identity (norm_in=False)

    packed = prepare_weights(params, heads=heads, dim_head=dim_head)
    bias = compute_attn_bias(params['rel_emb'], N, heads)     # (H, N, N+1) bf16
    cos, sin = rotary_tables(N, dim_head)                     # (N, dh)
    cosq = jnp.tile(cos, (1, heads))                          # (N, H*dh)
    sinq = jnp.tile(sin, (1, heads))

    if q_tile is None:
        q_tile = N
        for t in (512, 256, 128, 64, 32, 16, 8):
            if t <= N and N % t == 0:
                q_tile = t
                break

    for lw in packed['layers']:
        x = layer_block(x, lw, cosq, sinq, cos, sin, bias,
                        heads=heads, dim_head=dim_head, scale=cosine_sim_scale,
                        causal=causal, q_tile=q_tile)

    return final_block(x, packed['g_final'], packed['w_proj'])   # stable LN + proj


# ----------------------------------------------------------------------------
if __name__ == "__main__":
    B, N = 2, 16
    dim, depth, heads, dim_head, ff_mult = 32, 2, 4, 16, 4

    root = jax.random.PRNGKey(0)
    k_params, k_x = jax.random.split(root)

    params = init_params(k_params, dim=dim, depth=depth, heads=heads,
                         dim_head=dim_head, ff_mult=ff_mult)
    x = jax.random.normal(k_x, (B, N, dim), jnp.float32)

    # q_tile=8 forces a multi-tile grid to exercise the query-tiled causal path
    out = flagged_causal_transformer(x, params, heads=heads, dim_head=dim_head,
                                     causal=True, q_tile=8)
    jax.block_until_ready(out)
    assert out.shape == (B, N, dim) and out.dtype == jnp.float32
    assert bool(jnp.all(jnp.isfinite(out)))
    print("KERNEL_OK")
</pallas_src>

<mosaic_0001>
module attributes {stable_mosaic.version = 11 : i64} {
  func.func @_layer_kernel(%arg0: i32, %arg1: i32, %arg2: memref<1x8x32xf32, #tpu.memory_space<vmem>>, %arg3: memref<1x16x32xf32, #tpu.memory_space<vmem>>, %arg4: memref<1x32xf32, #tpu.memory_space<vmem>>, %arg5: memref<32x128xbf16, #tpu.memory_space<vmem>>, %arg6: memref<32x48xbf16, #tpu.memory_space<vmem>>, %arg7: memref<1x16xf32, #tpu.memory_space<vmem>>, %arg8: memref<1x16xf32, #tpu.memory_space<vmem>>, %arg9: memref<4x16x32xbf16, #tpu.memory_space<vmem>>, %arg10: memref<1x32xf32, #tpu.memory_space<vmem>>, %arg11: memref<8x64xf32, #tpu.memory_space<vmem>>, %arg12: memref<8x64xf32, #tpu.memory_space<vmem>>, %arg13: memref<16x16xf32, #tpu.memory_space<vmem>>, %arg14: memref<16x16xf32, #tpu.memory_space<vmem>>, %arg15: memref<4x8x17xbf16, #tpu.memory_space<vmem>>, %arg16: memref<1x32xf32, #tpu.memory_space<vmem>>, %arg17: memref<32x256xbf16, #tpu.memory_space<vmem>>, %arg18: memref<128x32xbf16, #tpu.memory_space<vmem>>, %arg19: memref<1x8x32xf32, #tpu.memory_space<vmem>>) attributes {dimension_semantics = [#tpu.dimension_semantics<parallel>, #tpu.dimension_semantics<parallel>], iteration_bounds = array<i64: 2, 2>, scalar_prefetch = 0 : i64, scratch_operands = 0 : i64, tpu.core_type = #tpu.core_type<tc>, window_params = [{transform_indices = @transform_0, window_bounds = array<i64: 1, 8, 32>}, {transform_indices = @transform_1, window_bounds = array<i64: 1, 16, 32>}, {pipeline_mode = #tpu.pipeline_mode<synchronous>, transform_indices = @transform_2, window_bounds = array<i64: 1, 32>}, {pipeline_mode = #tpu.pipeline_mode<synchronous>, transform_indices = @transform_3, window_bounds = array<i64: 32, 128>}, {pipeline_mode = #tpu.pipeline_mode<synchronous>, transform_indices = @transform_4, window_bounds = array<i64: 32, 48>}, {pipeline_mode = #tpu.pipeline_mode<synchronous>, transform_indices = @transform_5, window_bounds = array<i64: 1, 16>}, {pipeline_mode = #tpu.pipeline_mode<synchronous>, transform_indices = @transform_6, window_bounds = array<i64: 1, 16>}, {pipeline_mode = #tpu.pipeline_mode<synchronous>, transform_indices = @transform_7, window_bounds = array<i64: 4, 16, 32>}, {pipeline_mode = #tpu.pipeline_mode<synchronous>, transform_indices = @transform_8, window_bounds = array<i64: 1, 32>}, {transform_indices = @transform_9, window_bounds = array<i64: 8, 64>}, {transform_indices = @transform_10, window_bounds = array<i64: 8, 64>}, {pipeline_mode = #tpu.pipeline_mode<synchronous>, transform_indices = @transform_11, window_bounds = array<i64: 16, 16>}, {pipeline_mode = #tpu.pipeline_mode<synchronous>, transform_indices = @transform_12, window_bounds = array<i64: 16, 16>}, {transform_indices = @transform_13, window_bounds = array<i64: 4, 8, 17>}, {pipeline_mode = #tpu.pipeline_mode<synchronous>, transform_indices = @transform_14, window_bounds = array<i64: 1, 32>}, {pipeline_mode = #tpu.pipeline_mode<synchronous>, transform_indices = @transform_15, window_bounds = array<i64: 32, 256>}, {pipeline_mode = #tpu.pipeline_mode<synchronous>, transform_indices = @transform_16, window_bounds = array<i64: 128, 32>}, {transform_indices = @transform_17, window_bounds = array<i64: 1, 8, 32>}]} {
    %c0 = arith.constant 0 : index
    %c0_0 = arith.constant 0 : index
    %c0_1 = arith.constant 0 : index
    %0 = vector.load %arg2[%c0, %c0_0, %c0_1] : memref<1x8x32xf32, #tpu.memory_space<vmem>>, vector<1x8x32xf32>
    %1 = vector.shape_cast %0 : vector<1x8x32xf32> to vector<8x32xf32>
    %c0_2 = arith.constant 0 : index
    %c0_3 = arith.constant 0 : index
    %c0_4 = arith.constant 0 : index
    %2 = vector.load %arg3[%c0_2, %c0_3, %c0_4] : memref<1x16x32xf32, #tpu.memory_space<vmem>>, vector<1x16x32xf32>
    %3 = vector.shape_cast %2 : vector<1x16x32xf32> to vector<16x32xf32>
    %c0_5 = arith.constant 0 : index
    %c0_6 = arith.constant 0 : index
    %4 = vector.load %arg4[%c0_5, %c0_6] : memref<1x32xf32, #tpu.memory_space<vmem>>, vector<1x32xf32>
    %cst = arith.constant dense<0.000000e+00> : vector<16xf32>
    %5 = vector.multi_reduction <add>, %3, %cst [1] : vector<16x32xf32> to vector<16xf32>
    %6 = vector.shape_cast %5 : vector<16xf32> to vector<16x1xf32>
    %cst_7 = arith.constant 3.200000e+01 : f32
    %7 = vector.broadcast %cst_7 : f32 to vector<16x1xf32>
    %8 = arith.divf %6, %7 : vector<16x1xf32>
    %9 = vector.broadcast %8 : vector<16x1xf32> to vector<16x32xf32>
    %10 = arith.subf %3, %9 : vector<16x32xf32>
    %11 = arith.mulf %10, %10 : vector<16x32xf32>
    %cst_8 = arith.constant dense<0.000000e+00> : vector<16xf32>
    %12 = vector.multi_reduction <add>, %11, %cst_8 [1] : vector<16x32xf32> to vector<16xf32>
    %13 = vector.shape_cast %12 : vector<16xf32> to vector<16x1xf32>
    %cst_9 = arith.constant 3.200000e+01 : f32
    %14 = vector.broadcast %cst_9 : f32 to vector<16x1xf32>
    %15 = arith.divf %13, %14 : vector<16x1xf32>
    %16 = vector.broadcast %8 : vector<16x1xf32> to vector<16x32xf32>
    %17 = arith.subf %3, %16 : vector<16x32xf32>
    %cst_10 = arith.constant 9.99999974E-6 : f32
    %18 = vector.broadcast %cst_10 : f32 to vector<16x1xf32>
    %19 = arith.addf %15, %18 : vector<16x1xf32>
    %20 = math.rsqrt %19 : vector<16x1xf32>
    %21 = vector.broadcast %20 : vector<16x1xf32> to vector<16x32xf32>
    %22 = arith.mulf %17, %21 : vector<16x32xf32>
    %23 = vector.broadcast %4 : vector<1x32xf32> to vector<16x32xf32>
    %24 = arith.mulf %22, %23 : vector<16x32xf32>
    %25 = arith.truncf %24 : vector<16x32xf32> to vector<16x32xbf16>
    %c0_11 = arith.constant 0 : index
    %c0_12 = arith.constant 0 : index
    %26 = vector.load %arg6[%c0_11, %c0_12] : memref<32x48xbf16, #tpu.memory_space<vmem>>, vector<32x48xbf16>
    %cst_13 = arith.constant dense<0.000000e+00> : vector<16x48xf32>
    %27 = tpu.matmul %25, %26, %cst_13 {dimension_numbers = #tpu.dot_dimension_numbers<[1], [0], [0], [1], [0, 0, 1, 1], [], []>} : vector<16x32xbf16>, vector<32x48xbf16>, vector<16x48xf32> -> vector<16x48xf32>
    %28 = vector.extract_strided_slice %27 {offsets = [0, 0], sizes = [16, 16], strides = [1, 1]} : vector<16x48xf32> to vector<16x16xf32>
    %c0_14 = arith.constant 0 : index
    %c0_15 = arith.constant 0 : index
    %29 = vector.load %arg13[%c0_14, %c0_15] : memref<16x16xf32, #tpu.memory_space<vmem>>, vector<16x16xf32>
    %30 = arith.mulf %28, %29 : vector<16x16xf32>
    %31 = vector.extract_strided_slice %27 {offsets = [0, 16], sizes = [16, 16], strides = [1, 1]} : vector<16x48xf32> to vector<16x16xf32>
    %c0_16 = arith.constant 0 : index
    %c0_17 = arith.constant 0 : index
    %32 = vector.load %arg14[%c0_16, %c0_17] : memref<16x16xf32, #tpu.memory_space<vmem>>, vector<16x16xf32>
    %33 = arith.mulf %31, %32 : vector<16x16xf32>
    %34 = arith.addf %30, %33 : vector<16x16xf32>
    %35 = vector.extract_strided_slice %27 {offsets = [0, 32], sizes = [16, 16], strides = [1, 1]} : vector<16x48xf32> to vector<16x16xf32>
    %c0_18 = arith.constant 0 : index
    %c0_19 = arith.constant 0 : index
    %36 = vector.load %arg7[%c0_18, %c0_19] : memref<1x16xf32, #tpu.memory_space<vmem>>, vector<1x16xf32>
    %37 = tpu.concatenate %36, %34 in 0 : vector<1x16xf32>, vector<16x16xf32> -> vector<17x16xf32>
    %c0_20 = arith.constant 0 : index
    %c0_21 = arith.constant 0 : index
    %38 = vector.load %arg8[%c0_20, %c0_21] : memref<1x16xf32, #tpu.memory_space<vmem>>, vector<1x16xf32>
    %39 = tpu.concatenate %38, %35 in 0 : vector<1x16xf32>, vector<16x16xf32> -> vector<17x16xf32>
    %40 = arith.mulf %37, %37 : vector<17x16xf32>
    %cst_22 = arith.constant dense<0.000000e+00> : vector<17xf32>
    %41 = vector.multi_reduction <add>, %40, %cst_22 [1] : vector<17x16xf32> to vector<17xf32>
    %42 = vector.shape_cast %41 : vector<17xf32> to vector<17x1xf32>
    %cst_23 = arith.constant 1.000000e-24 : f32
    %43 = vector.broadcast %cst_23 : f32 to vector<17x1xf32>
    %44 = arith.maximumf %42, %43 : vector<17x1xf32>
    %45 = math.rsqrt %44 : vector<17x1xf32>
    %46 = vector.broadcast %45 : vector<17x1xf32> to vector<17x16xf32>
    %47 = arith.mulf %37, %46 : vector<17x16xf32>
    %c0_24 = arith.constant 0 : index
    %c0_25 = arith.constant 0 : index
    %48 = vector.load %arg4[%c0_24, %c0_25] : memref<1x32xf32, #tpu.memory_space<vmem>>, vector<1x32xf32>
    %cst_26 = arith.constant dense<0.000000e+00> : vector<8xf32>
    %49 = vector.multi_reduction <add>, %1, %cst_26 [1] : vector<8x32xf32> to vector<8xf32>
    %50 = vector.shape_cast %49 : vector<8xf32> to vector<8x1xf32>
    %cst_27 = arith.constant 3.200000e+01 : f32
    %51 = vector.broadcast %cst_27 : f32 to vector<8x1xf32>
    %52 = arith.divf %50, %51 : vector<8x1xf32>
    %53 = vector.broadcast %52 : vector<8x1xf32> to vector<8x32xf32>
    %54 = arith.subf %1, %53 : vector<8x32xf32>
    %55 = arith.mulf %54, %54 : vector<8x32xf32>
    %cst_28 = arith.constant dense<0.000000e+00> : vector<8xf32>
    %56 = vector.multi_reduction <add>, %55, %cst_28 [1] : vector<8x32xf32> to vector<8xf32>
    %57 = vector.shape_cast %56 : vector<8xf32> to vector<8x1xf32>
    %cst_29 = arith.constant 3.200000e+01 : f32
    %58 = vector.broadcast %cst_29 : f32 to vector<8x1xf32>
    %59 = arith.divf %57, %58 : vector<8x1xf32>
    %60 = vector.broadcast %52 : vector<8x1xf32> to vector<8x32xf32>
    %61 = arith.subf %1, %60 : vector<8x32xf32>
    %cst_30 = arith.constant 9.99999974E-6 : f32
    %62 = vector.broadcast %cst_30 : f32 to vector<8x1xf32>
    %63 = arith.addf %59, %62 : vector<8x1xf32>
    %64 = math.rsqrt %63 : vector<8x1xf32>
    %65 = vector.broadcast %64 : vector<8x1xf32> to vector<8x32xf32>
    %66 = arith.mulf %61, %65 : vector<8x32xf32>
    %67 = vector.broadcast %48 : vector<1x32xf32> to vector<8x32xf32>
    %68 = arith.mulf %66, %67 : vector<8x32xf32>
    %69 = arith.truncf %68 : vector<8x32xf32> to vector<8x32xbf16>
    %c0_31 = arith.constant 0 : index
    %c0_32 = arith.constant 0 : index
    %70 = vector.load %arg5[%c0_31, %c0_32] : memref<32x128xbf16, #tpu.memory_space<vmem>>, vector<32x128xbf16>
    %cst_33 = arith.constant dense<0.000000e+00> : vector<8x128xf32>
    %71 = tpu.matmul %69, %70, %cst_33 {dimension_numbers = #tpu.dot_dimension_numbers<[1], [0], [0], [1], [0, 0, 1, 1], [], []>} : vector<8x32xbf16>, vector<32x128xbf16>, vector<8x128xf32> -> vector<8x128xf32>
    %72 = vector.extract_strided_slice %71 {offsets = [0, 0], sizes = [8, 64], strides = [1, 1]} : vector<8x128xf32> to vector<8x64xf32>
    %c0_34 = arith.constant 0 : index
    %c0_35 = arith.constant 0 : index
    %73 = vector.load %arg11[%c0_34, %c0_35] : memref<8x64xf32, #tpu.memory_space<vmem>>, vector<8x64xf32>
    %74 = arith.mulf %72, %73 : vector<8x64xf32>
    %75 = vector.extract_strided_slice %71 {offsets = [0, 64], sizes = [8, 64], strides = [1, 1]} : vector<8x128xf32> to vector<8x64xf32>
    %c0_36 = arith.constant 0 : index
    %c0_37 = arith.constant 0 : index
    %76 = vector.load %arg12[%c0_36, %c0_37] : memref<8x64xf32, #tpu.memory_space<vmem>>, vector<8x64xf32>
    %77 = arith.mulf %75, %76 : vector<8x64xf32>
    %78 = arith.addf %74, %77 : vector<8x64xf32>
    %79 = vector.extract_strided_slice %78 {offsets = [0, 0], sizes = [8, 16], strides = [1, 1]} : vector<8x64xf32> to vector<8x16xf32>
    %80 = vector.extract_strided_slice %78 {offsets = [0, 16], sizes = [8, 16], strides = [1, 1]} : vector<8x64xf32> to vector<8x16xf32>
    %81 = vector.extract_strided_slice %78 {offsets = [0, 32], sizes = [8, 16], strides = [1, 1]} : vector<8x64xf32> to vector<8x16xf32>
    %82 = vector.extract_strided_slice %78 {offsets = [0, 48], sizes = [8, 16], strides = [1, 1]} : vector<8x64xf32> to vector<8x16xf32>
    %83 = tpu.concatenate %79, %80, %81, %82 in 0 : vector<8x16xf32>, vector<8x16xf32>, vector<8x16xf32>, vector<8x16xf32> -> vector<32x16xf32>
    %84 = arith.mulf %83, %83 : vector<32x16xf32>
    %cst_38 = arith.constant dense<0.000000e+00> : vector<32xf32>
    %85 = vector.multi_reduction <add>, %84, %cst_38 [1] : vector<32x16xf32> to vector<32xf32>
    %86 = vector.shape_cast %85 : vector<32xf32> to vector<32x1xf32>
    %cst_39 = arith.constant 1.000000e-24 : f32
    %87 = vector.broadcast %cst_39 : f32 to vector<32x1xf32>
    %88 = arith.maximumf %86, %87 : vector<32x1xf32>
    %89 = math.rsqrt %88 : vector<32x1xf32>
    %90 = vector.broadcast %89 : vector<32x1xf32> to vector<32x16xf32>
    %91 = arith.mulf %83, %90 : vector<32x16xf32>
    %cst_40 = arith.constant 1.600000e+01 : f32
    %92 = vector.broadcast %cst_40 : f32 to vector<32x16xf32>
    %93 = arith.mulf %91, %92 : vector<32x16xf32>
    %94 = arith.truncf %93 : vector<32x16xf32> to vector<32x16xbf16>
    %95 = arith.truncf %47 : vector<17x16xf32> to vector<17x16xbf16>
    %cst_41 = arith.constant dense<0.000000e+00> : vector<32x17xf32>
    %96 = tpu.matmul %94, %95, %cst_41 {dimension_numbers = #tpu.dot_dimension_numbers<[1], [1], [0], [0], [0, 0, 1, 0], [], []>} : vector<32x16xbf16>, vector<17x16xbf16>, vector<32x17xf32> -> vector<32x17xf32>
    %97 = vector.shape_cast %96 : vector<32x17xf32> to vector<4x8x17xf32>
    %c0_42 = arith.constant 0 : index
    %c0_43 = arith.constant 0 : index
    %c0_44 = arith.constant 0 : index
    %98 = vector.load %arg15[%c0_42, %c0_43, %c0_44] : memref<4x8x17xbf16, #tpu.memory_space<vmem>>, vector<4x8x17xbf16>
    %99 = arith.extf %98 : vector<4x8x17xbf16> to vector<4x8x17xf32>
    %100 = arith.addf %97, %99 : vector<4x8x17xf32>
    %101 = tpu.iota {dimensions = array<i32: 1>} : vector<4x8x17xi32>
    %c8_i32 = arith.constant 8 : i32
    %102 = arith.muli %arg1, %c8_i32 : i32
    %103 = vector.broadcast %102 : i32 to vector<4x8x17xi32>
    %104 = arith.addi %101, %103 : vector<4x8x17xi32>
    %105 = tpu.iota {dimensions = array<i32: 2>} : vector<4x8x17xi32>
    %c1_i32 = arith.constant 1 : i32
    %106 = vector.broadcast %c1_i32 : i32 to vector<4x8x17xi32>
    %107 = arith.addi %104, %106 : vector<4x8x17xi32>
    %108 = arith.cmpi sgt, %105, %107 : vector<4x8x17xi32>
    %cst_45 = arith.constant -1.000000e+30 : f32
    %109 = vector.broadcast %cst_45 : f32 to vector<4x8x17xf32>
    %110 = arith.select %108, %109, %100 : vector<4x8x17xi1>, vector<4x8x17xf32>
    %cst_46 = arith.constant dense<0xFF800000> : vector<4x8xf32>
    %111 = vector.multi_reduction <maximumf>, %110, %cst_46 [2] : vector<4x8x17xf32> to vector<4x8xf32>
    %112 = vector.shape_cast %111 : vector<4x8xf32> to vector<4x8x1xf32>
    %113 = vector.broadcast %112 : vector<4x8x1xf32> to vector<4x8x17xf32>
    %114 = arith.subf %110, %113 : vector<4x8x17xf32>
    %115 = math.exp %114 : vector<4x8x17xf32>
    %cst_47 = arith.constant dense<0.000000e+00> : vector<4x8xf32>
    %116 = vector.multi_reduction <add>, %115, %cst_47 [2] : vector<4x8x17xf32> to vector<4x8xf32>
    %117 = vector.shape_cast %116 : vector<4x8xf32> to vector<4x8x1xf32>
    %118 = vector.shape_cast %115 : vector<4x8x17xf32> to vector<32x17xf32>
    %119 = arith.truncf %118 : vector<32x17xf32> to vector<32x17xbf16>
    %120 = arith.truncf %39 : vector<17x16xf32> to vector<17x16xbf16>
    %cst_48 = arith.constant dense<0.000000e+00> : vector<32x16xf32>
    %121 = tpu.matmul %119, %120, %cst_48 {dimension_numbers = #tpu.dot_dimension_numbers<[1], [0], [0], [1], [0, 0, 1, 1], [], []>} : vector<32x17xbf16>, vector<17x16xbf16>, vector<32x16xf32> -> vector<32x16xf32>
    %122 = vector.shape_cast %117 : vector<4x8x1xf32> to vector<32x1xf32>
    %123 = tpu.reciprocal %122 {approx = true} : vector<32x1xf32> -> vector<32x1xf32>
    %124 = vector.broadcast %123 : vector<32x1xf32> to vector<32x16xf32>
    %125 = arith.mulf %121, %124 : vector<32x16xf32>
    %126 = vector.shape_cast %125 : vector<32x16xf32> to vector<4x8x16xf32>
    %127 = arith.truncf %126 : vector<4x8x16xf32> to vector<4x8x16xbf16>
    %c0_49 = arith.constant 0 : index
    %c0_50 = arith.constant 0 : index
    %c0_51 = arith.constant 0 : index
    %128 = vector.load %arg9[%c0_49, %c0_50, %c0_51] : memref<4x16x32xbf16, #tpu.memory_space<vmem>>, vector<4x16x32xbf16>
    %cst_52 = arith.constant dense<0.000000e+00> : vector<4x8x32xf32>
    %129 = tpu.matmul %127, %128, %cst_52 {dimension_numbers = #tpu.dot_dimension_numbers<[2], [1], [1], [2], [0, 0, 0, 1, 1, 2], [0], [0]>} : vector<4x8x16xbf16>, vector<4x16x32xbf16>, vector<4x8x32xf32> -> vector<4x8x32xf32>
    %cst_53 = arith.constant dense<0.000000e+00> : vector<8x32xf32>
    %130 = vector.multi_reduction <add>, %129, %cst_53 [0] : vector<4x8x32xf32> to vector<8x32xf32>
    %c0_54 = arith.constant 0 : index
    %c0_55 = arith.constant 0 : index
    %131 = vector.load %arg10[%c0_54, %c0_55] : memref<1x32xf32, #tpu.memory_space<vmem>>, vector<1x32xf32>
    %cst_56 = arith.constant dense<0.000000e+00> : vector<8xf32>
    %132 = vector.multi_reduction <add>, %130, %cst_56 [1] : vector<8x32xf32> to vector<8xf32>
    %133 = vector.shape_cast %132 : vector<8xf32> to vector<8x1xf32>
    %cst_57 = arith.constant 3.200000e+01 : f32
    %134 = vector.broadcast %cst_57 : f32 to vector<8x1xf32>
    %135 = arith.divf %133, %134 : vector<8x1xf32>
    %136 = vector.broadcast %135 : vector<8x1xf32> to vector<8x32xf32>
    %137 = arith.subf %130, %136 : vector<8x32xf32>
    %138 = arith.mulf %137, %137 : vector<8x32xf32>
    %cst_58 = arith.constant dense<0.000000e+00> : vector<8xf32>
    %139 = vector.multi_reduction <add>, %138, %cst_58 [1] : vector<8x32xf32> to vector<8xf32>
    %140 = vector.shape_cast %139 : vector<8xf32> to vector<8x1xf32>
    %cst_59 = arith.constant 3.200000e+01 : f32
    %141 = vector.broadcast %cst_59 : f32 to vector<8x1xf32>
    %142 = arith.divf %140, %141 : vector<8x1xf32>
    %143 = vector.broadcast %135 : vector<8x1xf32> to vector<8x32xf32>
    %144 = arith.subf %130, %143 : vector<8x32xf32>
    %cst_60 = arith.constant 9.99999974E-6 : f32
    %145 = vector.broadcast %cst_60 : f32 to vector<8x1xf32>
    %146 = arith.addf %142, %145 : vector<8x1xf32>
    %147 = math.rsqrt %146 : vector<8x1xf32>
    %148 = vector.broadcast %147 : vector<8x1xf32> to vector<8x32xf32>
    %149 = arith.mulf %144, %148 : vector<8x32xf32>
    %150 = vector.broadcast %131 : vector<1x32xf32> to vector<8x32xf32>
    %151 = arith.mulf %149, %150 : vector<8x32xf32>
    %152 = arith.addf %1, %151 : vector<8x32xf32>
    %c0_61 = arith.constant 0 : index
    %c0_62 = arith.constant 0 : index
    %153 = vector.load %arg16[%c0_61, %c0_62] : memref<1x32xf32, #tpu.memory_space<vmem>>, vector<1x32xf32>
    %cst_63 = arith.constant dense<0.000000e+00> : vector<8xf32>
    %154 = vector.multi_reduction <add>, %152, %cst_63 [1] : vector<8x32xf32> to vector<8xf32>
    %155 = vector.shape_cast %154 : vector<8xf32> to vector<8x1xf32>
    %cst_64 = arith.constant 3.200000e+01 : f32
    %156 = vector.broadcast %cst_64 : f32 to vector<8x1xf32>
    %157 = arith.divf %155, %156 : vector<8x1xf32>
    %158 = vector.broadcast %157 : vector<8x1xf32> to vector<8x32xf32>
    %159 = arith.subf %152, %158 : vector<8x32xf32>
    %160 = arith.mulf %159, %159 : vector<8x32xf32>
    %cst_65 = arith.constant dense<0.000000e+00> : vector<8xf32>
    %161 = vector.multi_reduction <add>, %160, %cst_65 [1] : vector<8x32xf32> to vector<8xf32>
    %162 = vector.shape_cast %161 : vector<8xf32> to vector<8x1xf32>
    %cst_66 = arith.constant 3.200000e+01 : f32
    %163 = vector.broadcast %cst_66 : f32 to vector<8x1xf32>
    %164 = arith.divf %162, %163 : vector<8x1xf32>
    %165 = vector.broadcast %157 : vector<8x1xf32> to vector<8x32xf32>
    %166 = arith.subf %152, %165 : vector<8x32xf32>
    %cst_67 = arith.constant 9.99999974E-6 : f32
    %167 = vector.broadcast %cst_67 : f32 to vector<8x1xf32>
    %168 = arith.addf %164, %167 : vector<8x1xf32>
    %169 = math.rsqrt %168 : vector<8x1xf32>
    %170 = vector.broadcast %169 : vector<8x1xf32> to vector<8x32xf32>
    %171 = arith.mulf %166, %170 : vector<8x32xf32>
    %172 = vector.broadcast %153 : vector<1x32xf32> to vector<8x32xf32>
    %173 = arith.mulf %171, %172 : vector<8x32xf32>
    %174 = arith.truncf %173 : vector<8x32xf32> to vector<8x32xbf16>
    %c0_68 = arith.constant 0 : index
    %c0_69 = arith.constant 0 : index
    %175 = vector.load %arg17[%c0_68, %c0_69] : memref<32x256xbf16, #tpu.memory_space<vmem>>, vector<32x256xbf16>
    %cst_70 = arith.constant dense<0.000000e+00> : vector<8x256xf32>
    %176 = tpu.matmul %174, %175, %cst_70 {dimension_numbers = #tpu.dot_dimension_numbers<[1], [0], [0], [1], [0, 0, 1, 1], [], []>} : vector<8x32xbf16>, vector<32x256xbf16>, vector<8x256xf32> -> vector<8x256xf32>
    %177 = vector.extract_strided_slice %176 {offsets = [0, 0], sizes = [8, 128], strides = [1, 1]} : vector<8x256xf32> to vector<8x128xf32>
    %178 = vector.extract_strided_slice %176 {offsets = [0, 128], sizes = [8, 128], strides = [1, 1]} : vector<8x256xf32> to vector<8x128xf32>
    %179 = arith.negf %178 : vector<8x128xf32>
    %180 = math.exp %179 : vector<8x128xf32>
    %cst_71 = arith.constant 1.000000e+00 : f32
    %181 = vector.broadcast %cst_71 : f32 to vector<8x128xf32>
    %182 = arith.addf %181, %180 : vector<8x128xf32>
    %183 = arith.divf %181, %182 : vector<8x128xf32>
    %184 = arith.mulf %178, %183 : vector<8x128xf32>
    %185 = arith.mulf %177, %184 : vector<8x128xf32>
    %186 = arith.truncf %185 : vector<8x128xf32> to vector<8x128xbf16>
    %c0_72 = arith.constant 0 : index
    %c0_73 = arith.constant 0 : index
    %187 = vector.load %arg18[%c0_72, %c0_73] : memref<128x32xbf16, #tpu.memory_space<vmem>>, vector<128x32xbf16>
    %cst_74 = arith.constant dense<0.000000e+00> : vector<8x32xf32>
    %188 = tpu.matmul %186, %187, %cst_74 {dimension_numbers = #tpu.dot_dimension_numbers<[1], [0], [0], [1], [0, 0, 1, 1], [], []>} : vector<8x128xbf16>, vector<128x32xbf16>, vector<8x32xf32> -> vector<8x32xf32>
    %189 = arith.addf %152, %188 : vector<8x32xf32>
    %c0_75 = arith.constant 0 : index
    %c0_76 = arith.constant 0 : index
    %c0_77 = arith.constant 0 : index
    %190 = vector.load %arg19[%c0_75, %c0_76, %c0_77] : memref<1x8x32xf32, #tpu.memory_space<vmem>>, vector<1x8x32xf32>
    %191 = vector.shape_cast %190 : vector<1x8x32xf32> to vector<8x32xf32>
    %192 = vector.shape_cast %189 : vector<8x32xf32> to vector<1x8x32xf32>
    tpu.vector_store %arg19[%c0_75, %c0_76, %c0_77], %192 {strides = array<i32>} : memref<1x8x32xf32, #tpu.memory_space<vmem>>, vector<1x8x32xf32>,
    return
  }
  func.func @transform_0(%arg0: i32, %arg1: i32) -> (i32, i32, i32) {
    %c0_i32 = arith.constant 0 : i32
    %c0_i32_0 = arith.constant 0 : i32
    return %arg0, %arg1, %c0_i32 : i32, i32, i32
  }
  func.func @transform_1(%arg0: i32, %arg1: i32) -> (i32, i32, i32) {
    %c0_i32 = arith.constant 0 : i32
    %c0_i32_0 = arith.constant 0 : i32
    %c0_i32_1 = arith.constant 0 : i32
    return %arg0, %c0_i32, %c0_i32_0 : i32, i32, i32
  }
  func.func @transform_2(%arg0: i32, %arg1: i32) -> (i32, i32) {
    %c0_i32 = arith.constant 0 : i32
    %c0_i32_0 = arith.constant 0 : i32
    %c0_i32_1 = arith.constant 0 : i32
    return %c0_i32, %c0_i32_0 : i32, i32
  }
  func.func @transform_3(%arg0: i32, %arg1: i32) -> (i32, i32) {
    %c0_i32 = arith.constant 0 : i32
    %c0_i32_0 = arith.constant 0 : i32
    %c0_i32_1 = arith.constant 0 : i32
    return %c0_i32, %c0_i32_0 : i32, i32
  }
  func.func @transform_4(%arg0: i32, %arg1: i32) -> (i32, i32) {
    %c0_i32 = arith.constant 0 : i32
    %c0_i32_0 = arith.constant 0 : i32
    %c0_i32_1 = arith.constant 0 : i32
    return %c0_i32, %c0_i32_0 : i32, i32
  }
  func.func @transform_5(%arg0: i32, %arg1: i32) -> (i32, i32) {
    %c0_i32 = arith.constant 0 : i32
    %c0_i32_0 = arith.constant 0 : i32
    %c0_i32_1 = arith.constant 0 : i32
    return %c0_i32, %c0_i32_0 : i32, i32
  }
  func.func @transform_6(%arg0: i32, %arg1: i32) -> (i32, i32) {
    %c0_i32 = arith.constant 0 : i32
    %c0_i32_0 = arith.constant 0 : i32
    %c0_i32_1 = arith.constant 0 : i32
    return %c0_i32, %c0_i32_0 : i32, i32
  }
  func.func @transform_7(%arg0: i32, %arg1: i32) -> (i32, i32, i32) {
    %c0_i32 = arith.constant 0 : i32
    %c0_i32_0 = arith.constant 0 : i32
    %c0_i32_1 = arith.constant 0 : i32
    %c0_i32_2 = arith.constant 0 : i32
    return %c0_i32, %c0_i32_0, %c0_i32_1 : i32, i32, i32
  }
  func.func @transform_8(%arg0: i32, %arg1: i32) -> (i32, i32) {
    %c0_i32 = arith.constant 0 : i32
    %c0_i32_0 = arith.constant 0 : i32
    %c0_i32_1 = arith.constant 0 : i32
    return %c0_i32, %c0_i32_0 : i32, i32
  }
  func.func @transform_9(%arg0: i32, %arg1: i32) -> (i32, i32) {
    %c0_i32 = arith.constant 0 : i32
    %c0_i32_0 = arith.constant 0 : i32
    return %arg1, %c0_i32 : i32, i32
  }
  func.func @transform_10(%arg0: i32, %arg1: i32) -> (i32, i32) {
    %c0_i32 = arith.constant 0 : i32
    %c0_i32_0 = arith.constant 0 : i32
    return %arg1, %c0_i32 : i32, i32
  }
  func.func @transform_11(%arg0: i32, %arg1: i32) -> (i32, i32) {
    %c0_i32 = arith.constant 0 : i32
    %c0_i32_0 = arith.constant 0 : i32
    %c0_i32_1 = arith.constant 0 : i32
    return %c0_i32, %c0_i32_0 : i32, i32
  }
  func.func @transform_12(%arg0: i32, %arg1: i32) -> (i32, i32) {
    %c0_i32 = arith.constant 0 : i32
    %c0_i32_0 = arith.constant 0 : i32
    %c0_i32_1 = arith.constant 0 : i32
    return %c0_i32, %c0_i32_0 : i32, i32
  }
  func.func @transform_13(%arg0: i32, %arg1: i32) -> (i32, i32, i32) {
    %c0_i32 = arith.constant 0 : i32
    %c0_i32_0 = arith.constant 0 : i32
    %c0_i32_1 = arith.constant 0 : i32
    return %c0_i32, %arg1, %c0_i32_0 : i32, i32, i32
  }
  func.func @transform_14(%arg0: i32, %arg1: i32) -> (i32, i32) {
    %c0_i32 = arith.constant 0 : i32
    %c0_i32_0 = arith.constant 0 : i32
    %c0_i32_1 = arith.constant 0 : i32
    return %c0_i32, %c0_i32_0 : i32, i32
  }
  func.func @transform_15(%arg0: i32, %arg1: i32) -> (i32, i32) {
    %c0_i32 = arith.constant 0 : i32
    %c0_i32_0 = arith.constant 0 : i32
    %c0_i32_1 = arith.constant 0 : i32
    return %c0_i32, %c0_i32_0 : i32, i32
  }
  func.func @transform_16(%arg0: i32, %arg1: i32) -> (i32, i32) {
    %c0_i32 = arith.constant 0 : i32
    %c0_i32_0 = arith.constant 0 : i32
    %c0_i32_1 = arith.constant 0 : i32
    return %c0_i32, %c0_i32_0 : i32, i32
  }
  func.func @transform_17(%arg0: i32, %arg1: i32) -> (i32, i32, i32) {
    %c0_i32 = arith.constant 0 : i32
    %c0_i32_0 = arith.constant 0 : i32
    return %arg0, %arg1, %c0_i32 : i32, i32, i32
  }
}

</mosaic_0001>

<bundles_post_ra>
// kernel: tpu_custom_call.1
= control target key start
LH: loop header
LB: loop body
LE: loop exit
PB: predicated region body
PF: predicated region fallthrough
CT: control target
= control target key end

     0   :  { %s3691_s0 = inlined_call_operand.vmem [shape: f32[2,16,32], index: 0, kind: input, shape index: {}]   ;;  %s3692_s1 = inlined_call_operand.vmem [shape: f32[2,16,32], index: 1, kind: input, shape index: {}]   ;;  %s3693_s2 = inlined_call_operand.vmem [shape: f32[1,32], index: 2, kind: input, shape index: {}]   ;;  %s3694_s3 = inlined_call_operand.hbm [shape: bf16[32,128], index: 3, kind: input, shape index: {}]   ;;  %s3695_s4 = inlined_call_operand.hbm [shape: bf16[32,48], index: 4, kind: input, shape index: {}]   ;;  %s3696_s5 = inlined_call_operand.hbm [shape: f32[1,16], index: 5, kind: input, shape index: {}]   ;;  %s3697_s6 = inlined_call_operand.hbm [shape: f32[1,16], index: 6, kind: input, shape index: {}]   ;;  %s3698_s7 = inlined_call_operand.vmem [shape: bf16[4,16,32], index: 7, kind: input, shape index: {}]   ;;  %s3699_s8 = inlined_call_operand.hbm [shape: f32[1,32], index: 8, kind: input, shape index: {}]   ;;  %s3700_s9 = inlined_call_operand.hbm [shape: f32[16,64], index: 9, kind: input, shape index: {}]   ;;  %s3701_s10 = inlined_call_operand.hbm [shape: f32[16,64], index: 10, kind: input, shape index: {}]   ;;  %s3702_s11 = inlined_call_operand.hbm [shape: f32[16,16], index: 11, kind: input, shape index: {}]   ;;  %s3703_s12 = inlined_call_operand.hbm [shape: f32[16,16], index: 12, kind: input, shape index: {}]   ;;  %s3704_s13 = inlined_call_operand.vmem [shape: bf16[4,16,17], index: 13, kind: input, shape index: {}]   ;;  %s3705_s14 = inlined_call_operand.vmem [shape: f32[1,32], index: 14, kind: input, shape index: {}]   ;;  %s3706_s15 = inlined_call_operand.hbm [shape: bf16[32,256], index: 15, kind: input, shape index: {}]   ;;  %s3707_s16 = inlined_call_operand.vmem [shape: bf16[128,32], index: 16, kind: input, shape index: {}]   ;;  %s3708_s17 = inlined_call_operand.hbm [shape: f32[2,16,32], index: 17, kind: output, shape index: {}]  }
   0x1   :  { %3736 = sst [smem:[#allocation44_spill]] %s3691_s0 }
   0x2   :  { %3737 = sst [smem:[#allocation45_spill]] %s3692_s1 }
   0x3   :  { %3738 = sst [smem:[#allocation46_spill]] %s3693_s2 }
   0x4   :  { %3739 = sst [smem:[#allocation47_spill]] %s3695_s4 }
   0x5   :  { %3740 = sst [smem:[#allocation48_spill]] %s3697_s6 }
   0x6   :  { %3741 = sst [smem:[#allocation49_spill]] %s3698_s7 }
   0x7   :  { %3742 = sst [smem:[#allocation50_spill]] %s3705_s14 }
   0x8   :  { %3743 = sst [smem:[#allocation51_spill]] %s3707_s16 }
   0x9   :  { %3744 = sst [smem:[#allocation52_spill]] %s3708_s17 }
   0xa   :  { %22 = vsyncpa [#allocation3], 0 }
   0xb   :  { %23 = vsyncpa [#allocation6], 0 }
   0xc   :  { %24 = vsyncpa [#allocation9], 0 }
   0xd   :  { %25 = vsyncpa [#allocation12], 0 }
   0xe   :  { %27 = vsyncpa [#allocation12 + $0x1], 0 }
   0xf   :  { %28 = vsyncpa [#allocation15], 0 }
  0x10   :  { %29 = vsyncpa [#allocation19], 0 }
  0x11   :  { %30 = vsyncpa [#allocation4], 0 }
  0x12   :  { %32 = vsyncpa [#allocation4 + $0x1], 0  ;;  %s3036_s24 = smov 0   ;;  %s3038_s25 = smov 0  }
  0x13   :  { %s3040_s26 = smov 0   ;;  %s3042_s27 = smov 0  }
  0x14   :  { %s3044_s28 = smov 0   ;;  %s3046_s29 = smov 0  }
  0x15   :  { %s3048_s0 = smov 0   ;;  %s3050_s30 = smov 0  }
  0x16   :  { %s3052_s18 = smov 0   ;;  %s3054_s19 = smov 0  }
  0x17   :  { %s3056_s1 = smov 0  }
  0x18 LB: > { %3745 = sst [smem:[#allocation28_spill]] %s2881_s24  ;;  %s3090_s20 = sadd.s32 4294967295, %s2921_s1   ;;  %s2921_s1 = sphi %s3056_s1, %s38_s1   ;;  %s2917_s19 = sphi %s3054_s19, %s3815_s19   ;;  %s2913_s18 = sphi %s3052_s18, %s3819_s18   ;;  %s2909_s30 = sphi %s3050_s30, %s3813_s30   ;;  %s2905_s0 = sphi %s3048_s0, %s3818_s0   ;;  %s2901_s29 = sphi %s3046_s29, %s3817_s29   ;;  %s2897_s28 = sphi %s3044_s28, %s3816_s28   ;;  %s2893_s27 = sphi %s3042_s27, %s3811_s27   ;;  %s2889_s26 = sphi %s3040_s26, %s3810_s26   ;;  %s2885_s25 = sphi %s3038_s25, %s3809_s25   ;;  %s2881_s24 = sphi %s3036_s24, %s3808_s24  }
  0x19   : > { %3746 = sst [smem:[#allocation29_spill]] %s2885_s25  ;;  %s2042_s21 = sadd.s32 4294967294, %s2921_s1  }
  0x1a   : > { %3747 = sst [smem:[#allocation30_spill]] %s2889_s26  ;;  %s47_s22 = sadd.s32 1, %s2913_s18 }
  0x1b   : > { %3748 = sst [smem:[#allocation31_spill]] %s2897_s28  ;;  %s50_s23 = sadd.s32 1, %s2917_s19 }
  0x1c   : > { %3749 = sst [smem:[#allocation32_spill]] %s2905_s0  ;;  %p48_p0 = scmp.ge.s32.totalorder %s47_s22, 2 }
  0x1d   : > { %3750 = sst [smem:[#allocation33_spill]] %s2909_s30  ;;  %s258_s17 = sadd.s32 1, %s2901_s29 }
  0x1e   : > { %3751 = sst [smem:[#allocation34_spill]] %s2917_s19  ;;  %p265_p1 = scmp.ne.s32.totalorder %s2901_s29, %s2897_s28 }
  0x1f   : > { %3752 = sst [smem:[#allocation35_spill]] %s3090_s20  ;;  %p266_p2 = scmp.eq.s32.totalorder %s2921_s1, 0 }
  0x20   : > { %s3821_s22 = smov (%p48_p0, %s47_s22), 0  ;;  %s3823_s23 = smov (!%p48_p0, %s50_s23), %s2917_s19 }
  0x21   : > { %3753 = sst [smem:[#allocation36_spill]] %s3821_s22  ;;  %s255_s16 = ssub.s32 %s2913_s18, %s3821_s22 }
  0x22   : > { %p3104_p3 = por %p266_p2, %p265_p1  ;;  %p52_p4 = scmp.ge.s32.totalorder %s3823_s23, 2 }
  0x23   : > { %p256_p5 = scmp.eq.s32.totalorder %s255_s16, 0  ;;  %p271_p6 = scmp.ne.s32.totalorder %s2897_s28, %s2893_s27 }
  0x24   : > { %s3754_s14 = scalar_select %p3104_p3, 1, 0 }
  0x25   : > { %p3723_p7 = scmp.eq.s32.totalorder %s3090_s20, 0  ;;  %s3825_s23 = smov (%p52_p4, %s3823_s23), 0 }
  0x26   : > { %3755 = sst [smem:[#allocation37_spill]] %s3825_s23  ;;  %s438_s22 = ssub.s32 %s2917_s19, %s3825_s23 }
  0x27   : > { %s3113_s7 = scalar_select %p256_p5, %s2901_s29, %s258_s17  }
  0x28   : > { %p3117_p8 = por %p3723_p7, %p271_p6  ;;  %s440_s0 = sor.u32 %s438_s22, %s255_s16 }
  0x29   : > { %3756 = sst [smem:[#allocation38_spill]] %s3113_s7  ;;  %s443_s30 = sadd.s32 1, %s2889_s26 }
  0x2a   : > { %s3757_s2 = scalar_select %p3117_p8, 1, 0 }
  0x2b   : > { %p441_p9 = scmp.eq.s32.totalorder %s440_s0, 0  ;;  %p453_p10 = scmp.ne.s32.totalorder %s2889_s26, %s2885_s25 }
  0x2c   : > { %3758 = sst [smem:[#allocation39_spill]] %s3757_s2  ;;  %p454_p11 = scmp.eq.s32.totalorder %s3090_s20, 3 }
  0x2d   : > { %p459_p12 = scmp.ne.s32.totalorder %s2885_s25, %s2881_s24  ;;  %p460_p0 = scmp.eq.s32.totalorder %s2042_s21, 3 }
  0x2e   : > { %s3130_s27 = scalar_select %p441_p9, %s2889_s26, %s443_s30  }
  0x2f   : > { %p3132_p13 = por %p454_p11, %p453_p10  ;;  %p2043_p1 = scmp.ge.s32.totalorder %s2921_s1, 1 }
  0x30   : > { %3759 = sst [smem:[#allocation40_spill]] %s3130_s27  ;;  %p467_p2 = scmp.lt.s32.totalorder %s2921_s1, 5 }
  0x31   : > { %s3760_s28 = scalar_select %p3132_p13, 1, 0 }
  0x32   : > { %p3138_p4 = por %p460_p0, %p459_p12  ;;  %p3142_p5 = pnand %p2043_p1, %p467_p2 }
  0x33   : > { %3761 = sst [smem:[#allocation41_spill]] %s3760_s28  ;;  %s2923_s0 = smov [#allocation5]  }
  0x34   : > { %s3762_s17 = scalar_select %p3138_p4, 1, 0 }
  0x35   : > { %s3764_s16 = scalar_select %p3142_p5, 1, 0 }
  0x36   : > { %3763 = sst [smem:[#allocation42_spill]] %s3762_s17  ;;  %p2274_p6 = pneg %p3142_p5 }
  0x37   : > { %3765 = sst [smem:[#allocation43_spill]] %s3764_s16  ;;  %s495_s30 = sshll.u32 %s2923_s0, 4  ;;  %s3148_s30 = int_to_ptr.vmem [resolvable:$true] %s495_s30 }
  0x38   : > { %p3152_p9 = pnand %p2274_p6, %p3723_p7  ;;  %s2924_s22 = smov [#allocation8]  }
  0x39   : > { %s520_s23 = sshll.u32 %s2924_s22, 4  ;;  %s2925_s19 = smov [#allocation14]   ;;  %s3156_s23 = int_to_ptr.vmem [resolvable:$true] %s520_s23 }
  0x3a   : > { %s3158_s7 = sshll.u32 %s2925_s19, 4  ;;  %s3767_s4 = sld [smem:[#allocation47_spill]]  ;;  %s545_s7 = int_to_ptr.vmem [resolvable:$true] %s3158_s7 }
  0x3b   : > { %p3168_p11 = pneg %p3152_p9 }
  0x40   : > { %s2499_s17 = scalar_lea.hbm %s3767_s4, 256 }
  0x41   : > { %p2500_p10 = scmp.ne.s32.totalorder %s3767_s4, %s2499_s17  ;;  %p2506_p1 = scmp.lt.u32.totalorder %s2499_s17, %s3767_s4 }
  0x43   : > { %p2502_p12 = pnand %p3168_p11, %p2500_p10 }
  0x45   : > { %p2503_p0 = pneg %p2502_p12 }
  0x47   : > { %p2508_p2 = pnand %p2506_p1, %p2503_p0 }
  0x49   : > { %2511 = shalt.err (!%p2508_p2)
}
  0x4a   : > { %s2512_s24 = scalar_lea.vmem %s3148_s30, 256  ;;  %p2520_p13 = scmp.lt.s32.totalorder %s3148_s30, %s3148_s30 }
  0x4b   : > { %p2513_p6 = scmp.ne.s32.totalorder %s3148_s30, %s2512_s24  ;;  %p2521_p8 = scmp.lt.s32.totalorder %s2512_s24, %s2512_s24 }
  0x4d   : > { %p2515_p7 = pnand %p2513_p6, %p3168_p11  ;;  %p2522_p10 = por %p2521_p8, %p2520_p13 }
  0x4f   : > { %p2516_p4 = pneg %p2515_p7 }
  0x51   : > { %p2523_p12 = pnand %p2522_p10, %p2516_p4 }
  0x53   : > { %2526 = shalt.err (!%p2523_p12)
}
  0x54   : > { %s3734_s26 = smov 64   ;;  %s3735_s27 = smov 4  }
  0x55   : > { %2280 = dma.hbm_to_vmem [thread:$0]  (!%p3152_p9), %s3767_s4, 256, %s3148_s30, [#allocation6], %s3734_s26, %s3734_s26, %s3735_s27  }
  0x56   : > { %s3769_s6 = sld [smem:[#allocation48_spill]] }
  0x5c   : > { %s2527_s24 = scalar_lea.hbm %s3769_s6, 16 }
  0x5d   : > { %p2528_p7 = scmp.ne.s32.totalorder %s3769_s6, %s2527_s24  ;;  %p2534_p4 = scmp.lt.u32.totalorder %s2527_s24, %s3769_s6 }
  0x5f   : > { %p2530_p8 = pnand %p2528_p7, %p3168_p11 }
  0x61   : > { %p2531_p13 = pneg %p2530_p8 }
  0x63   : > { %p2536_p0 = pnand %p2534_p4, %p2531_p13 }
  0x65   : > { %2539 = shalt.err (!%p2536_p0)
}
  0x66   : > { %s2540_s30 = scalar_lea.vmem %s3156_s23, 16  ;;  %s2547_s2 = scalar_lea.vmem %s3156_s23, 32 }
  0x67   : > { %p2541_p1 = scmp.ne.s32.totalorder %s3156_s23, %s2540_s30  ;;  %p2548_p10 = scmp.lt.s32.totalorder %s3156_s23, %s3156_s23 }
  0x68   : > { %p2549_p12 = scmp.lt.s32.totalorder %s2547_s2, %s2540_s30 }
  0x69   : > { %p2543_p2 = pnand %p2541_p1, %p3168_p11 }
  0x6a   : > { %p2550_p7 = por %p2549_p12, %p2548_p10 }
  0x6b   : > { %p2544_p6 = pneg %p2543_p2 }
  0x6d   : > { %p2551_p8 = pnand %p2550_p7, %p2544_p6 }
  0x6f   : > { %2554 = shalt.err (!%p2551_p8)
}
  0x70   : > { %2286 = dma.hbm_to_vmem [thread:$0]  (!%p3152_p9), %s3769_s6, 16, %s3156_s23, [#allocation9]  }
  0x71   : > { %s2555_s0 = scalar_lea.hbm %s3702_s11, 256 }
  0x72   : > { %p2556_p13 = scmp.ne.s32.totalorder %s3702_s11, %s2555_s0  ;;  %p2562_p1 = scmp.lt.u32.totalorder %s2555_s0, %s3702_s11 }
  0x74   : > { %p2558_p4 = pnand %p2556_p13, %p3168_p11 }
  0x76   : > { %p2559_p0 = pneg %p2558_p4 }
  0x78   : > { %p2564_p2 = pnand %p2562_p1, %p2559_p0 }
  0x7a   : > { %2567 = shalt.err (!%p2564_p2)
}
  0x7b   : > { %s2568_s2 = scalar_lea.vmem %s545_s7, 256  ;;  %p2576_p7 = scmp.lt.s32.totalorder %s545_s7, %s545_s7 }
  0x7c   : > { %p2569_p6 = scmp.ne.s32.totalorder %s545_s7, %s2568_s2  ;;  %p2577_p8 = scmp.lt.s32.totalorder %s2568_s2, %s2568_s2 }
  0x7e   : > { %p2571_p10 = pnand %p2569_p6, %p3168_p11  ;;  %p2578_p5 = por %p2577_p8, %p2576_p7 }
  0x80   : > { %p2572_p12 = pneg %p2571_p10 }
  0x82   : > { %p2579_p3 = pnand %p2578_p5, %p2572_p12 }
  0x84   : > { %2582 = shalt.err (!%p2579_p3)
}
  0x85   : > { %s2928_s23 = smov 128   ;;  %s2929_s25 = smov 8  }
  0x86   : > { %2292 = dma.hbm_to_vmem [thread:$0]  (!%p3152_p9), %s3702_s11, 256, %s545_s7, [#allocation15], %s2928_s23, %s2928_s23, %s2929_s25  }
  0x87   : > { %s2930_s17 = smov [#allocation2]   ;;  %s2931_s22 = smov [#allocation7]  }
  0x88   : > { %s482_s0 = sshll.u32 %s2930_s17, 4  ;;  %s509_s19 = sshll.u32 %s2931_s22, 4  ;;  %s483_s0 = int_to_ptr.vmem [resolvable:$true] %s482_s0  ;;  %s510_s19 = int_to_ptr.vmem [resolvable:$true] %s509_s19 }
  0x89   : > { %s2583_s2 = scalar_lea.hbm %s3694_s3, 256 }
  0x8a   : > { %p2584_p3 = scmp.ne.s32.totalorder %s3694_s3, %s2583_s2  ;;  %p2590_p4 = scmp.lt.u32.totalorder %s2583_s2, %s3694_s3 }
  0x8c   : > { %p2586_p5 = pnand %p2584_p3, %p3168_p11 }
  0x8e   : > { %p2587_p13 = pneg %p2586_p5 }
  0x90   : > { %p2592_p0 = pnand %p2590_p4, %p2587_p13 }
  0x92   : > { %2595 = shalt.err (!%p2592_p0)
}
  0x93   : > { %s2596_s7 = scalar_lea.vmem %s483_s0, 256  ;;  %p2604_p10 = scmp.lt.s32.totalorder %s483_s0, %s483_s0 }
  0x94   : > { %p2597_p1 = scmp.ne.s32.totalorder %s483_s0, %s2596_s7  ;;  %p2605_p12 = scmp.lt.s32.totalorder %s2596_s7, %s2596_s7 }
  0x96   : > { %p2599_p2 = pnand %p2597_p1, %p3168_p11  ;;  %p2606_p7 = por %p2605_p12, %p2604_p10 }
  0x98   : > { %p2600_p6 = pneg %p2599_p2 }
  0x9a   : > { %p2607_p8 = pnand %p2606_p7, %p2600_p6 }
  0x9c   : > { %2610 = shalt.err (!%p2607_p8)
}
  0x9d   : > { %s3770_s26 = smov 4   ;;  %s3771_s27 = smov 64  }
  0x9e   : > { %2277 = dma.hbm_to_vmem [thread:$0]  (!%p3152_p9), %s3694_s3, 256, %s483_s0, [#allocation3], %s3771_s27, %s3771_s27, %s3770_s26  }
  0x9f   : > { %s2611_s17 = scalar_lea.hbm %s3696_s5, 16 }
  0xa0   : > { %p2612_p3 = scmp.ne.s32.totalorder %s3696_s5, %s2611_s17  ;;  %p2618_p4 = scmp.lt.u32.totalorder %s2611_s17, %s3696_s5 }
  0xa2   : > { %p2614_p5 = pnand %p2612_p3, %p3168_p11 }
  0xa4   : > { %p2615_p13 = pneg %p2614_p5 }
  0xa6   : > { %p2620_p0 = pnand %p2618_p4, %p2615_p13 }
  0xa8   : > { %2623 = shalt.err (!%p2620_p0)
}
  0xa9   : > { %s2624_s7 = scalar_lea.vmem %s510_s19, 16  ;;  %s2631_s0 = scalar_lea.vmem %s510_s19, 32 }
  0xaa   : > { %p2625_p1 = scmp.ne.s32.totalorder %s510_s19, %s2624_s7  ;;  %p2632_p10 = scmp.lt.s32.totalorder %s510_s19, %s510_s19 }
  0xab   : > { %p2633_p12 = scmp.lt.s32.totalorder %s2631_s0, %s2624_s7 }
  0xac   : > { %p2627_p2 = pnand %p2625_p1, %p3168_p11 }
  0xad   : > { %p2634_p7 = por %p2633_p12, %p2632_p10 }
  0xae   : > { %p2628_p6 = pneg %p2627_p2 }
  0xb0   : > { %p2635_p8 = pnand %p2634_p7, %p2628_p6 }
  0xb2   : > { %2638 = shalt.err (!%p2635_p8)
}
  0xb3   : > { %2283 = dma.hbm_to_vmem [thread:$0]  (!%p3152_p9), %s3696_s5, 16, %s510_s19, [#allocation6]  }
  0xb4   : > { %s2932_s4 = smov [#allocation10]   ;;  %s2933_s20 = smov [#allocation16]  }
  0xb5   : > { %s534_s6 = sshll.u32 %s2932_s4, 4  ;;  %s557_s16 = sshll.u32 %s2933_s20, 4  ;;  %s535_s6 = int_to_ptr.vmem [resolvable:$true] %s534_s6  ;;  %s558_s16 = int_to_ptr.vmem [resolvable:$true] %s557_s16 }
  0xb6   : > { %s2639_s24 = scalar_lea.hbm %s3699_s8, 16 }
  0xb7   : > { %p2640_p3 = scmp.ne.s32.totalorder %s3699_s8, %s2639_s24  ;;  %p2646_p4 = scmp.lt.u32.totalorder %s2639_s24, %s3699_s8 }
  0xb9   : > { %p2642_p5 = pnand %p2640_p3, %p3168_p11 }
  0xbb   : > { %p2643_p13 = pneg %p2642_p5 }
  0xbd   : > { %p2648_p0 = pnand %p2646_p4, %p2643_p13 }
  0xbf   : > { %2651 = shalt.err (!%p2648_p0)
}
  0xc0   : > { %s2652_s19 = scalar_lea.vmem %s535_s6, 16  ;;  %s2659_s26 = scalar_lea.vmem %s535_s6, 32 }
  0xc1   : > { %p2653_p1 = scmp.ne.s32.totalorder %s535_s6, %s2652_s19  ;;  %p2660_p10 = scmp.lt.s32.totalorder %s535_s6, %s535_s6 }
  0xc2   : > { %p2661_p12 = scmp.lt.s32.totalorder %s2659_s26, %s2652_s19 }
  0xc3   : > { %p2655_p2 = pnand %p2653_p1, %p3168_p11 }
  0xc4   : > { %p2662_p7 = por %p2661_p12, %p2660_p10 }
  0xc5   : > { %p2656_p6 = pneg %p2655_p2 }
  0xc7   : > { %p2663_p8 = pnand %p2662_p7, %p2656_p6 }
  0xc9   : > { %2666 = shalt.err (!%p2663_p8)
}
  0xca   : > { %2289 = dma.hbm_to_vmem [thread:$0]  (!%p3152_p9), %s3699_s8, 16, %s535_s6, [#allocation9]  }
  0xcb   : > { %s2667_s22 = scalar_lea.hbm %s3703_s12, 256 }
  0xcc   : > { %p2668_p3 = scmp.ne.s32.totalorder %s3703_s12, %s2667_s22  ;;  %p2674_p4 = scmp.lt.u32.totalorder %s2667_s22, %s3703_s12 }
  0xce   : > { %p2670_p5 = pnand %p2668_p3, %p3168_p11 }
  0xd0   : > { %p2671_p13 = pneg %p2670_p5 }
  0xd2   : > { %p2676_p0 = pnand %p2674_p4, %p2671_p13 }
  0xd4   : > { %2679 = shalt.err (!%p2676_p0)
}
  0xd5   : > { %s2680_s0 = scalar_lea.vmem %s558_s16, 256  ;;  %p2688_p10 = scmp.lt.s32.totalorder %s558_s16, %s558_s16 }
  0xd6   : > { %p2681_p1 = scmp.ne.s32.totalorder %s558_s16, %s2680_s0  ;;  %p2689_p12 = scmp.lt.s32.totalorder %s2680_s0, %s2680_s0 }
  0xd8   : > { %p2683_p2 = pnand %p2681_p1, %p3168_p11  ;;  %p2690_p7 = por %p2689_p12, %p2688_p10 }
  0xda   : > { %p2684_p6 = pneg %p2683_p2 }
  0xdc   : > { %p2691_p8 = pnand %p2690_p7, %p2684_p6 }
  0xde   : > { %2694 = shalt.err (!%p2691_p8)
}
  0xdf   : > { %2295 = dma.hbm_to_vmem [thread:$0]  (!%p3152_p9), %s3703_s12, 256, %s558_s16, [#allocation15], %s2928_s23, %s2928_s23, %s2929_s25  }
  0xe0   : > { %s2934_s26 = smov [#allocation18]   ;;  %s2695_s17 = scalar_lea.hbm %s3706_s15, 512 }
  0xe1   : > { %s573_s27 = sshll.u32 %s2934_s26, 4  ;;  %p2696_p3 = scmp.ne.s32.totalorder %s3706_s15, %s2695_s17  ;;  %s574_s27 = int_to_ptr.vmem [resolvable:$true] %s573_s27 }
  0xe2   : > { %p2702_p4 = scmp.lt.u32.totalorder %s2695_s17, %s3706_s15 }
  0xe3   : > { %p2698_p5 = pnand %p2696_p3, %p3168_p11 }
  0xe5   : > { %p2699_p13 = pneg %p2698_p5 }
  0xe7   : > { %p2704_p0 = pnand %p2702_p4, %p2699_p13 }
  0xe9   : > { %2707 = shalt.err (!%p2704_p0)
}
  0xea   : > { %s2708_s16 = scalar_lea.vmem %s574_s27, 512  ;;  %p2716_p10 = scmp.lt.s32.totalorder %s574_s27, %s574_s27 }
  0xeb   : > { %p2709_p1 = scmp.ne.s32.totalorder %s574_s27, %s2708_s16  ;;  %p2717_p12 = scmp.lt.s32.totalorder %s2708_s16, %s2708_s16 }
  0xed   : > { %p2711_p2 = pnand %p2709_p1, %p3168_p11  ;;  %p2718_p7 = por %p2717_p12, %p2716_p10 }
  0xef   : > { %p2712_p6 = pneg %p2711_p2 }
  0xf1   : > { %p2719_p8 = pnand %p2718_p7, %p2712_p6 }
  0xf3   : > { %2722 = shalt.err (!%p2719_p8)
}
  0xf4   : > { %2298 = dma.hbm_to_vmem [thread:$0]  (!%p3152_p9), %s3706_s15, 512, %s574_s27, [#allocation19], %s2928_s23, %s2928_s23, %s2929_s25  }
  0xf5   : > { %p2052_p3 = scmp.ge.s32.totalorder %s2921_s1, 4 }
  0xf6   : > { %s609_s28 = sand.u32 (!%p2052_p3), 1, %s2921_s1   ;;  %s611_s6 = sand.u32 (!%p2052_p3), 1, %s2901_s29  }
  0xf7   : > { %586 = sbr.rel (%p2052_p3) target bundleno = 303 (0x12f), region = 64  ;;  %s3342_s21 = sshll.u32 (!%p2052_p3), %s611_s6, 3 }
  0xf8   : > { %s2054_s19 = sshll.u32 (!%p2052_p3), %s2913_s18, 7  ;;  %s613_s25 = scalar_lea.vmem (!%p2052_p3), [#allocation11], %s3342_s21 }
  0xf9   : > { %s3350_s23 = scalar_lea.hbm (!%p2052_p3), %s3700_s9, %s2054_s19  ;;  %s620_s27 = sshll.u32 (!%p2052_p3), %s613_s25, 4  ;;  %s621_s27 = int_to_ptr.vmem [resolvable:$true] %s620_s27 }
  0xfa   : > { %s3353_s20 = scalar_lea.sflag (!%p2052_p3), [#allocation12], %s609_s28  ;;  %s2723_s17 = scalar_lea.hbm (!%p2052_p3), %s3350_s23, 128 }
  0xfb   : > { %p2724_p9 = scmp.ne.s32.totalorder (!%p2052_p3), %s3350_s23, %s2723_s17  ;;  %p3772_p11 = scmp.ne.s32.totalorder (!%p2052_p3), %s3754_s14, 0 }
  0xfc   : > { %s2727_s30 = scalar_lea.hbm (!%p2052_p3), %s3700_s9, 256  ;;  %p2728_p4 = scmp.lt.u32.totalorder (!%p2052_p3), %s3350_s23, %s3700_s9 }
  0xfd   : > { %p2725_p5 = pnand (!%p2052_p3), %p2724_p9, %p3772_p11  ;;  %p2729_p0 = scmp.lt.u32.totalorder (!%p2052_p3), %s2727_s30, %s2723_s17 }
  0xfe   : > { %p2731_p2 = scmp.lt.u32.totalorder %s2723_s17, %s3350_s23 }
  0xff   : > { %p2726_p13 = pneg %p2725_p5  ;;  %p2730_p1 = por %p2729_p0, %p2728_p4 }
 0x101   : > { %p2732_p6 = por %p2731_p2, %p2730_p1 }
 0x103   : > { %p2733_p10 = pnand %p2732_p6, %p2726_p13 }
 0x105   : > { %2736 = shalt.err (!%p2733_p10)
}
 0x106   : > { %s2737_s7 = scalar_lea.vmem %s621_s27, 128  ;;  %s2935_s0 = smov [#allocation11]  }
 0x107   : > { %p2738_p12 = scmp.ne.s32.totalorder %s621_s27, %s2737_s7  ;;  %s2741_s28 = sshll.u32 %s2935_s0, 4  ;;  %s2742_s28 = int_to_ptr.vmem [resolvable:$false] %s2741_s28 }
 0x108   : > { %s2743_s26 = scalar_lea.vmem %s2742_s28, 256  ;;  %p2744_p3 = scmp.lt.s32.totalorder %s621_s27, %s2742_s28 }
 0x109   : > { %p2739_p7 = pnand %p2738_p12, %p3772_p11  ;;  %p2745_p9 = scmp.lt.s32.totalorder %s2743_s26, %s2737_s7 }
 0x10b   : > { %p2740_p8 = pneg %p2739_p7  ;;  %p2746_p5 = por %p2745_p9, %p2744_p3 }
 0x10d   : > { %p2747_p0 = pnand %p2746_p5, %p2740_p8 }
 0x10f   : > { %2750 = shalt.err (!%p2747_p0)
}
 0x110   : > { %2252 = dma.hbm_to_vmem [thread:$0]  (%p3772_p11), %s3350_s23, 128, %s621_s27, %s3353_s20  }
 0x111   : > { %s3378_s17 = scalar_lea.hbm %s3701_s10, %s2054_s19  ;;  %s631_s22 = scalar_lea.vmem [#allocation13], %s3342_s21 }
 0x112   : > { %s638_s24 = sshll.u32 %s631_s22, 4  ;;  %s2751_s30 = scalar_lea.hbm %s3378_s17, 128  ;;  %s639_s24 = int_to_ptr.vmem [resolvable:$true] %s638_s24 }
 0x113   : > { %p2752_p13 = scmp.ne.s32.totalorder %s3378_s17, %s2751_s30  ;;  %s2755_s27 = scalar_lea.hbm %s3701_s10, 256 }
 0x114   : > { %p2756_p2 = scmp.lt.u32.totalorder %s3378_s17, %s3701_s10  ;;  %p2757_p6 = scmp.lt.u32.totalorder %s2755_s27, %s2751_s30 }
 0x115   : > { %p2753_p4 = pnand %p2752_p13, %p3772_p11  ;;  %p2759_p12 = scmp.lt.u32.totalorder %s2751_s30, %s3378_s17 }
 0x116   : > { %p2758_p10 = por %p2757_p6, %p2756_p2 }
 0x117   : > { %p2754_p1 = pneg %p2753_p4 }
 0x118   : > { %p2760_p7 = por %p2759_p12, %p2758_p10 }
 0x11a   : > { %p2761_p8 = pnand %p2760_p7, %p2754_p1 }
 0x11c   : > { %2764 = shalt.err (!%p2761_p8)
}
 0x11d   : > { %s2765_s21 = scalar_lea.vmem %s639_s24, 128  ;;  %s2936_s19 = smov [#allocation13]  }
 0x11e   : > { %p2766_p3 = scmp.ne.s32.totalorder %s639_s24, %s2765_s21  ;;  %s2769_s0 = sshll.u32 %s2936_s19, 4  ;;  %s2770_s0 = int_to_ptr.vmem [resolvable:$false] %s2769_s0 }
 0x11f   : > { %s2771_s28 = scalar_lea.vmem %s2770_s0, 256  ;;  %p2772_p0 = scmp.lt.s32.totalorder %s639_s24, %s2770_s0 }
 0x120   : > { %p2767_p9 = pnand %p2766_p3, %p3772_p11  ;;  %p2773_p13 = scmp.lt.s32.totalorder %s2771_s28, %s2765_s21 }
 0x122   : > { %p2768_p5 = pneg %p2767_p9  ;;  %p2774_p4 = por %p2773_p13, %p2772_p0 }
 0x124   : > { %p2775_p2 = pnand %p2774_p4, %p2768_p5 }
 0x126   : > { %2778 = shalt.err (!%p2775_p2)
}
 0x127   : > { %2253 = dma.hbm_to_vmem [thread:$0]  (%p3772_p11), %s3378_s17, 128, %s639_s24, %s3353_s20  }
 0x128   : > { %644 = sbr.rel (!%p3772_p11) target bundleno = 303 (0x12f), region = 84  ;;  %s2057_s26 = sshll.u32 (%p3772_p11), %s611_s6, 4 }
 0x129   : > { %s2058_s4 = sshll.u32 (%p3772_p11), %s2913_s18, 2  ;;  %s648_s2 = scalar_lea.vmem (%p3772_p11), [#allocation17], %s2057_s26 }
 0x12a   : > { %s650_s30 = scalar_lea.vmem (%p3772_p11), %s3704_s13, %s2058_s4 }
 0x12b   : > { %v666_v0 = vld [vmem:[%s650_s30] sm:$0xf] (%p3772_p11)  ;;  %v668_v1 = vld [vmem:[%s650_s30 + $0x8] sm:$0xf] (%p3772_p11)  ;;  %v670_v2 = vld [vmem:[%s650_s30 + $0x10] sm:$0xf] (%p3772_p11) }
 0x12c   : > { %667 = vst [vmem:[%s648_s2] sm:$0xf] (%p3772_p11), %v666_v0  ;;  %669 = vst [vmem:[%s648_s2 + $0x4] sm:$0xf] (%p3772_p11), %v668_v1  ;;  %v672_v3 = vld [vmem:[%s650_s30 + $0x18] sm:$0xf] (%p3772_p11) }
 0x12d   : > { %671 = vst [vmem:[%s648_s2 + $0x8] sm:$0xf] (%p3772_p11), %v670_v2  ;;  %673 = vst [vmem:[%s648_s2 + $0xc] sm:$0xf] (%p3772_p11), %v672_v3 }
 0x12f PF: > { %s3773_s14 = sld [smem:[#allocation43_spill]] }
 0x135   : > { %p3774_p11 = scmp.ne.s32.totalorder %s3773_s14, 0 }
 0x136   : > { %s3775_s6 = sld [smem:[#allocation35_spill]] (!%p3774_p11) }
 0x137   : > { %707 = sbr.rel (%p3774_p11) target bundleno = 3205 (0xc85), region = 125 }
 0x13c   : > { %p3776_p1 = scmp.eq.s32.totalorder (!%p3774_p11), %s3775_s6, 0 }
 0x13e   : > { %2852 = dma.done.wait (%p3776_p1), [#allocation3], 256   ;;  %p3777_p6 = pmov %p3776_p1 }
 0x13f   : > { %p3778_p10 = pmov %p3776_p1 }
 0x140   : > { %2854 = vsyncadd (%p3777_p6), [#allocation3], 4294967040 }
 0x141   : > { %2856 = dma.done.wait (%p3778_p10), [#allocation6], 272   ;;  %p3779_p12 = pmov %p3776_p1 }
 0x142   : > { %p3780_p7 = pmov %p3776_p1 }
 0x143   : > { %2858 = vsyncadd (%p3779_p12), [#allocation6], 4294967024 }
 0x144   : > { %2860 = dma.done.wait (%p3780_p7), [#allocation9], 32   ;;  %p3781_p8 = pmov %p3776_p1 }
 0x145   : > { %s3782_s20 = sld [smem:[#allocation31_spill]]  ;;  %s3783_s17 = sld [smem:[#allocation39_spill]] }
 0x146   : > { %2862 = vsyncadd (%p3781_p8), [#allocation9], 4294967264  ;;  %s729_s24 = sand.u32 1, %s3775_s6  }
 0x147   : > { %s730_s16 = scalar_lea.sflag [#allocation12], %s729_s24 }
 0x14b   : > { %s731_s23 = sand.u32 1, %s3782_s20   ;;  %p3784_p3 = scmp.ne.s32.totalorder %s3783_s17, 0 }
 0x14c   : > { %s3423_s27 = sshll.u32 %s731_s23, 3 }
 0x14d   : > { %2864 = dma.done.wait (%p3784_p3), %s730_s16, 256  }
 0x14e   : > { %2866 = vsyncadd (%p3784_p3), %s730_s16, 4294967040  ;;  %s742_s21 = scalar_lea.vmem [#allocation13], %s3423_s27  ;;  %p3785_p9 = pmov %p3776_p1 }
 0x14f   : > { %p3786_p5 = pmov %p3776_p1 }
 0x150   : > { %2868 = dma.done.wait (%p3785_p9), [#allocation15], 512  }
 0x151   : > { %2870 = vsyncadd (%p3786_p5), [#allocation15], 4294966784  ;;  %s3435_s19 = sshll.u32 %s731_s23, 4  ;;  %p3787_p0 = pmov %p3776_p1 }
 0x153   : > { %2872 = dma.done.wait (%p3787_p0), [#allocation19], 512   ;;  %p3788_p13 = pmov %p3787_p0 }
 0x154   : > { %s3789_s28 = sld [smem:[#allocation33_spill]]  ;;  %s3790_s26 = sld [smem:[#allocation32_spill]]  ;;  %vm852_vm0 = vcmask 261120   ;;  %v2433_v25 = vld [vmem:[#allocation2] sm:$0xff]   ;;  %v2434_v26 = vld [vmem:[#allocation5] sm:$0xff]   ;;  %v2937_v27 = vmov 0.0  }
 0x155   : > { %2874 = vsyncadd (%p3788_p13), [#allocation19], 4294966784  ;;  %s3791_s17 = sld [smem:[#allocation45_spill]]  ;;  %s3792_s0 = sld [smem:[#allocation44_spill]]  ;;  %2166 = vmatprep.subr.bf16.mxu1 %v2937_v27  ;;  %2158 = vmatprep.subr.bf16.mxu0 %v2937_v27  ;;  %v2435_v28 = vld [vmem:[#allocation2 + $0x8] sm:$0xff]   ;;  %vm2938_vm1 = vmmov 0  }
 0x156   : > { %2167 = vmatpush3.bf16.msra.mxu1 %v2433_v25  ;;  %2159 = vmatpush3.bf16.msra.mxu0 %v2434_v26  ;;  %v2436_v29 = vld [vmem:[#allocation5 + $0x8] sm:$0xff]   ;;  %vm978_vm2 = vcmask 1040384   ;;  %s2943_s14 = smov 80   ;;  %vm1005_vm3 = vcmask 130048   ;;  %vm1012_vm4 = vcmask 122880   ;;  %s3795_s20 = scalar_lea.vmem [#allocation17], %s3435_s19 }
 0x157   : > { %2168 = vmatprep.subr.bf16.mxu1 %v2937_v27  ;;  %2170 = vmatprep.mubr.msk.bf16.mxu1 %vm2938_vm1, %v2937_v27  ;;  %v1101_v30 = vld [vmem:[%s742_s21] sm:$0xff]  ;;  %vm1244_vm6 = vcmask 138240   ;;  %s3802_s16 = sld [smem:[#allocation41_spill]] }
 0x158   : > { %2160 = vmatprep.subr.bf16.mxu0 %v2937_v27  ;;  %2162 = vmatprep.mubr.msk.bf16.mxu0 %vm2938_vm1, %v2937_v27  ;;  %v953_v31 = vld [vmem:[#allocation16] sm:$0xff]  ;;  %v954_v32 = vld [vmem:[#allocation16 + $0x8] sm:$0xff] }
 0x15a   : > { %p834_p4 = scmp.lt.s32.totalorder %s3789_s28, 1  ;;  %p836_p2 = scmp.lt.s32.totalorder %s3790_s26, 1  ;;  %2169 = vmatpush3.bf16.msra.mxu1 %v2435_v28  ;;  %2161 = vmatpush3.bf16.msra.mxu0 %v2436_v29 }
 0x15b   : > { %2196 = vmatprep.subr.bf16.mxu0 %v2937_v27 }
 0x15c   : > { %s835_s4 = scalar_select %p834_p4, %s3789_s28, 1 }
 0x15d   : > { %s837_s25 = scalar_select %p836_p2, %s3790_s26, 1 }
 0x15e   : > { %s2072_s22 = sshll.u32 %s835_s4, 1  ;;  %s2117_s30 = sshll.u32 %s835_s4, 4 }
 0x15f   : > { %s839_s2 = sadd.s32 %s2072_s22, %s837_s25  ;;  %s846_s24 = scalar_lea.vmem %s3791_s17, %s2117_s30 }
 0x160   : > { %s2073_s23 = sshll.u32 %s839_s2, 3  ;;  %v850_v4 = vld [vmem:[%s846_s24 + $0x8] sm:$0xff]  ;;  %v849_v5 = vld [vmem:[%s846_s24] sm:$0xff]  ;;  %s3793_s25 = sld [smem:[#allocation46_spill]] }
 0x161   : > { %s841_s7 = scalar_lea.vmem %s3792_s0, %s2073_s23  ;;  %v856_v7 = vsel %vm852_vm0, %v850_v4, 0.0  ;;  %v853_v8 = vsel %vm852_vm0, %v849_v5, 0.0  ;;  %s2940_s0 = smov 16  }
 0x162   : > { %v3452_v6 = vld [vmem:[%s841_s7] sm:$0xff]  ;;  %857 = vadd.xlane.f32.xlu1 %v856_v7  ;;  %s2939_s7 = smov 64   ;;  %s2941_s22 = smov 112  }
 0x163   : > { %v1025_v9 = vsel %vm852_vm0, %v3452_v6, 0.0  ;;  %s3794_s30 = scalar_lea.vmem [#allocation11], %s3423_s27  ;;  %s2942_s2 = smov 96  }
 0x164   : > { %1026 = vadd.xlane.f32.xlu0 %v1025_v9  ;;  %v1099_v9 = vld [vmem:[%s3794_s30] sm:$0xff]  ;;  %s2085_s27 = sshll.u32 %s3790_s26, 3  ;;  %s3796_s17 = smov %s3795_s20 }
 0x165   : > { %s3797_s23 = sld [smem:[#allocation49_spill]]  ;;  %s3798_s30 = sld [smem:[#allocation50_spill]] }
 0x166   : > { %v2076_v43 = vld [vmem:[%s3793_s25] ss:$0 sm:$0xff]  ;;  %s2113_s24 = sshll.u32 %s3789_s28, 1  ;;  %p3804_p1 = scmp.ne.s32.totalorder %s3802_s16, 0 }
 0x167   : > { %s1807_s6 = sadd.s32 %s3790_s26, %s2113_s24 }
 0x168   : > { %854 = vadd.xlane.f32.xlu0 %v853_v8 }
 0x1ef   : > { %v858_v10 = vpop.xlane.xlu1 %857 }
 0x1f0   : > { %v861_v12 = vmul.f32 0.03125, %v858_v10 }
 0x1f1   : > { %v1027_v11 = vpop.xlane.xlu0 %1026 }
 0x1f2   : > { %v1028_v13 = vmul.f32 0.03125, %v1027_v11  ;;  %v863_v14 = vsub.f32 %v850_v4, %v861_v12 }
 0x1f4   : > { %v1029_v15 = vsub.f32 %v3452_v6, %v1028_v13  ;;  %v865_v19 = vmul.f32 %v863_v14, %v863_v14  ;;  %v950_v13 = vld [vmem:[#allocation14 + $0x8] sm:$0xff] }
 0x1f5   : > { %v855_v16 = vpop.xlane.xlu0 %854 }
 0x1f6   : > { %v860_v17 = vmul.f32 0.03125, %v855_v16  ;;  %v1030_v18 = vmul.f32 %v1029_v15, %v1029_v15  ;;  %v869_v22 = vsel %vm852_vm0, %v865_v19, 0.0 }
 0x1f8   : > { %v862_v20 = vsub.f32 %v849_v5, %v860_v17  ;;  %v1031_v21 = vsel %vm852_vm0, %v1030_v18, 0.0 }
 0x1f9   : > { %1032 = vadd.xlane.f32.xlu1 %v1031_v21 }
 0x1fa   : > { %v864_v23 = vmul.f32 %v862_v20, %v862_v20 }
 0x1fc   : > { %v866_v24 = vsel %vm852_vm0, %v864_v23, 0.0  ;;  %v975_v23 = vld [vmem:[#allocation7] sm:$0x1] }
 0x1fd   : > { %870 = vadd.xlane.f32.xlu1 %v869_v22  ;;  %867 = vadd.xlane.f32.xlu0 %v866_v24 }
 0x20e   : > { %957 = vrot.lane.b32.xlu1 %v953_v31, %s2940_s0 }
 0x212   : > { %959 = vrot.lane.b32.xlu1 %v954_v32, %s2940_s0 }
 0x213   : > { %1103 = vrot.lane.b32.xlu0 %v1101_v30, %s2939_s7 }
 0x286   : > { %v1033_v33 = vpop.xlane.xlu1 %1032 }
 0x287   : > { %v1034_v34 = vmul.f32 0.03125, %v1033_v33 }
 0x289   : > { %v1035_v35 = vadd.f32 1e-05, %v1034_v34 }
 0x28a   : > { %v871_v36 = vpop.xlane.xlu1 %870  ;;  %v868_v37 = vpop.xlane.xlu0 %867 }
 0x28b   : > { %2455 = vrsqrt.f32 %v1035_v35  ;;  %v873_v38 = vmul.f32 0.03125, %v871_v36  ;;  %v872_v39 = vmul.f32 0.03125, %v868_v37 }
 0x28d   : > { %v875_v40 = vadd.f32 1e-05, %v873_v38  ;;  %v874_v41 = vadd.f32 1e-05, %v872_v39 }
 0x28e   : > { %v1104_v54 = vpop.permute.xlu0 %1103  ;;  %v958_v55 = vpop.permute.xlu1 %957 }
 0x28f   : > { %2457 = vrsqrt.f32 %v875_v40 }
 0x290   : > { %2459 = vrsqrt.f32 %v874_v41 }
 0x292   : > { %v960_v62 = vpop.permute.xlu1 %959 }
 0x295   : > { %v2456_v42 = vpop.eup %2455 }
 0x296   : > { %v1037_v44 = vmul.f32 %v2456_v42, %v1029_v15 }
 0x298   : > { %v1038_v45 = vmul.f32 %v2076_v43, %v1037_v44 }
 0x299   : > { %v2458_v46 = vpop.eup %2457 }
 0x29a   : > { %v2460_v47 = vpop.eup %2459  ;;  %v1039_v48 = vpack.c.bf16 %v1038_v45, %v1038_v45  ;;  %v879_v49 = vmul.f32 %v2458_v46, %v863_v14  ;;  %v949_v14 = vld [vmem:[#allocation14] sm:$0xff] }
 0x29b   : > { %v878_v50 = vmul.f32 %v2460_v47, %v862_v20 }
 0x29c   : > { %2171 = vmatmul.mubr.msk.bf16.vlgmr.msra.gmra.mrb[0].mxu1 %vm852_vm0, %v1039_v48  ;;  %v887_v51 = vmul.f32 %v2076_v43, %v879_v49 }
 0x29d   : > { %v886_v52 = vmul.f32 %v2076_v43, %v878_v50 }
 0x29f   : > { %v888_v53 = vpack.c.bf16 %v887_v51, %v886_v52 }
 0x2a1   : > { %2163 = vmatmul.mubr.msk.bf16.vlgmr.msra.gmra.mrb[0].mxu0 %vm852_vm0, %v888_v53 }
 0x2a2   : > { %2198 = vmatprep.mubr.msk.bf16.mxu0 %vm2938_vm1, %v2937_v27 }
 0x36f   : > { %v1093_v56 = vpop.f32.mrb[0].mxu1 }
 0x370   : > { %v1106_v57 = vmul.f32 %v1104_v54, %v1093_v56  ;;  %v2172_v58 = vpop.f32.mrb[1].mxu1  ;;  %v1100_v10 = vmul.f32 %v1099_v9, %v1093_v56 }
 0x371   : > { %v1096_v59 = vpop.f32.mrb[2].mxu1 }
 0x372   : > { %v2173_v60 = vpop.f32.mrb[3].mxu1  ;;  %1108 = vrot.lane.b32.xlu1 %v1106_v57, %s2939_s7  ;;  %s2114_s7 = sshll.u32 %s1807_s6, 7 }
 0x374   : > { %v942_v61 = vpop.f32.mrb[0].mxu0 }
 0x375   : > { %v963_v63 = vmul.f32 %v958_v55, %v942_v61  ;;  %v2164_v0 = vpop.f32.mrb[1].mxu0  ;;  %v989_v2 = vrot.slane %v942_v61, 7  ;;  %v951_v18 = vmul.f32 %v949_v14, %v942_v61 }
 0x376   : > { %v3482_v1 = vpop.f32.mrb[2].mxu0 }
 0x377   : > { %v964_v3 = vmul.f32 %v960_v62, %v3482_v1  ;;  %v990_v4 = vrot.slane %v3482_v1, 7  ;;  %967 = vrot.lane.b32.xlu0 %v963_v63, %s2941_s22  ;;  %v2165_v5 = vpop.f32.mrb[3].mxu0  ;;  %v952_v17 = vmul.f32 %v950_v13, %v3482_v1 }
 0x379   : > { %969 = vrot.lane.b32.xlu1 %v964_v3, %s2941_s22  ;;  %v991_v7 = vsel %vm978_vm2, %v989_v2, %v990_v4 }
 0x37a   : > { %v3489_v8 = vpack.i.bf16 %v991_v7, %v989_v2 }
 0x3e4   : > { %v1109_v11 = vpop.permute.xlu1 %1108 }
 0x3e5   : > { %v3493_v12 = vadd.f32 %v1109_v11, %v1100_v10 }
 0x3e7   : > { %1116 = vrot.lane.b32.xlu1 %v3493_v12, %s2942_s2  ;;  %1113 = vrot.lane.b32.xlu0 %v3493_v12, %s2941_s22  ;;  %v1122_v33 = vmul.f32 %v3493_v12, %v3493_v12  ;;  %s3803_s22 = sld [smem:[#allocation52_spill]] }
 0x3e9   : > { %v968_v16 = vpop.permute.xlu0 %967  ;;  %v1126_v34 = vsel %vm1005_vm3, %v1122_v33, 0.0 }
 0x3ea   : > { %v973_v20 = vadd.f32 %v968_v16, %v951_v18 }
 0x3eb   : > { %1119 = vrot.lane.b32.xlu0 %v3493_v12, %s2943_s14  ;;  %v970_v15 = vpop.permute.xlu1 %969 }
 0x3ec   : > { %v974_v19 = vadd.f32 %v970_v15, %v952_v17  ;;  %v979_v22 = vrot.slane %v973_v20, 7 }
 0x3ee   : > { %v980_v21 = vrot.slane %v974_v19, 7  ;;  %v985_v25 = vsel %vm978_vm2, %v975_v23, %v979_v22 }
 0x3ef   : > { %v1002_v28 = vmul.f32 %v985_v25, %v985_v25 }
 0x3f0   : > { %v981_v24 = vsel %vm978_vm2, %v979_v22, %v980_v21  ;;  %v1004_v30 = vmul.f32 %v980_v21, %v980_v21 }
 0x3f1   : > { %v1003_v26 = vmul.f32 %v981_v24, %v981_v24  ;;  %v1006_v31 = vsel %vm1005_vm3, %v1002_v28, 0.0  ;;  %v2119_v28 = vld [vmem:[%s3796_s17] sm:$0xff]  }
 0x3f2   : > { %v1013_v32 = vsel %vm1012_vm4, %v1004_v30, 0.0 }
 0x3f3   : > { %v1009_v29 = vsel %vm1005_vm3, %v1003_v26, 0.0  ;;  %v2126_v26 = vld [vmem:[%s3795_s20 + $0x8] sm:$0xff]  }
 0x3f4   : > { %v2125_v33 = vunpack.c.h.bf16 %v2126_v26 }
 0x40a   : > { %1010 = vadd.xlane.f32.xlu0 %v1009_v29 }
 0x40b   : > { %1007 = vadd.xlane.f32.xlu1 %v1006_v31  ;;  %v2124_v31 = vunpack.c.l.bf16 %v2126_v26 }
 0x40e   : > { %1014 = vadd.xlane.f32.xlu0 %v1013_v32  ;;  %v2120_v32 = vunpack.c.l.bf16 %v2119_v28 }
 0x412   : > { %1127 = vadd.xlane.f32.xlu0 %v1126_v34 }
 0x459   : > { %v1117_v35 = vpop.permute.xlu1 %1116  ;;  %v1114_v36 = vpop.permute.xlu0 %1113 }
 0x45a   : > { %v1124_v37 = vmul.f32 %v1117_v35, %v1117_v35  ;;  %v1123_v38 = vmul.f32 %v1114_v36, %v1114_v36 }
 0x45c   : > { %v1132_v39 = vsel %vm1005_vm3, %v1124_v37, 0.0  ;;  %v1129_v40 = vsel %vm1005_vm3, %v1123_v38, 0.0 }
 0x45d   : > { %1133 = vadd.xlane.f32.xlu0 %v1132_v39  ;;  %1130 = vadd.xlane.f32.xlu1 %v1129_v40  ;;  %v1120_v41 = vpop.permute.xlu0 %1119 }
 0x45e   : > { %v1125_v42 = vmul.f32 %v1120_v41, %v1120_v41 }
 0x460   : > { %v1135_v43 = vsel %vm1005_vm3, %v1125_v42, 0.0 }
 0x461   : > { %1136 = vadd.xlane.f32.xlu1 %v1135_v43 }
 0x497   : > { %v1011_v44 = vpop.xlane.xlu0 %1010 }
 0x498   : > { %v1017_v45 = vmax.f32 %v1011_v44, 1e-24  ;;  %v1008_v46 = vpop.xlane.xlu1 %1007 }
 0x499   : > { %v1016_v47 = vmax.f32 %v1008_v46, 1e-24 }
 0x49a   : > { %2461 = vrsqrt.f32 %v1017_v45 }
 0x49b   : > { %2463 = vrsqrt.f32 %v1016_v47  ;;  %v1015_v48 = vpop.xlane.xlu0 %1014 }
 0x49c   : > { %v1018_v49 = vmax.f32 %v1015_v48, 1e-24 }
 0x49e   : > { %2465 = vrsqrt.f32 %v1018_v49 }
 0x49f   : > { %v1128_v60 = vpop.xlane.xlu0 %1127 }
 0x4a0   : > { %v1138_v61 = vmax.f32 %v1128_v60, 1e-24 }
 0x4a2   : > { %2467 = vrsqrt.f32 %v1138_v61 }
 0x4a4   : > { %v2462_v50 = vpop.eup %2461 }
 0x4a5   : > { %v2464_v51 = vpop.eup %2463  ;;  %v1023_v52 = vmul.f32 %v2462_v50, %v981_v24  ;;  %v1234_v24 = vstv %s2085_s27  ;;  %s3799_s27 = sld [smem:[#allocation51_spill]] }
 0x4a6   : > { %v1022_v53 = vmul.f32 %v2464_v51, %v985_v25 }
 0x4a8   : > { %v2466_v54 = vpop.eup %2465  ;;  %v1156_v55 = vpack.c.bf16 %v1023_v52, %v1022_v53 }
 0x4a9   : > { %v1024_v56 = vmul.f32 %v2466_v54, %v980_v21 }
 0x4aa   : > { %2234 = vmatprep.subr.msk.bf16.mxu1 %vm1005_vm3, %v1156_v55  ;;  %v1165_v57 = vsel %vm1005_vm3, %v1156_v55, 0 }
 0x4ab   : > { %2175 = vmatpush3.bf16.xpose.msra.mxu1 %v1165_v57  ;;  %v1157_v58 = vpack.c.bf16 %v1024_v56, %v1024_v56  ;;  %s3800_s20 = smov %s3799_s27 }
 0x4ac   : > { %v2468_v7 = vpop.eup %2467 }
 0x4ad   : > { %2235 = vmatprep.subr.msk.bf16.mxu1 %vm1005_vm3, %v1157_v58  ;;  %v1168_v59 = vsel %vm1005_vm3, %v1157_v58, 0  ;;  %v1146_v9 = vmul.f32 %v2468_v7, %v3493_v12  ;;  %v1231_v12 = vlaneseq }
 0x4af   : > { %v1150_v15 = vmul.f32 16.0, %v1146_v9  ;;  %v1232_v23 = vshrl.u32 %v1231_v12, 7  ;;  %v1237_v29 = vand.u32 127, %v1231_v12  ;;  %v2438_v12 = vld [vmem:[%s3797_s23 + $0x8] sm:$0xff]  }
 0x4b0   : > { %2197 = vmatpush3.bf16.msra.mxu0 %v2438_v12 }
 0x4b1   : > { %v1235_v25 = vadd.s32 %v1234_v24, %v1232_v23  ;;  %2208 = vmatprep.subr.bf16.mxu0 %v2937_v27 }
 0x4b3   : > { %2177 = vmatpush3.bf16.xpose.msra.mxu1 %v1168_v59  ;;  %v1238_v30 = vadd.s32 1, %v1235_v25 }
 0x4b5   : > { %vm1239_vm5 = vcmp.gt.s32.totalorder %v1237_v29, %v1238_v30 }
 0x4ea   : > { %v1131_v62 = vpop.xlane.xlu1 %1130  ;;  %v1134_v63 = vpop.xlane.xlu0 %1133 }
 0x4eb   : > { %v1139_v0 = vmax.f32 %v1131_v62, 1e-24  ;;  %v1140_v2 = vmax.f32 %v1134_v63, 1e-24  ;;  %v986_v62 = vld [vmem:[#allocation8] sm:$0x1] }
 0x4ed   : > { %2469 = vrsqrt.f32 %v1139_v0 }
 0x4ee   : > { %2471 = vrsqrt.f32 %v1140_v2  ;;  %v1137_v3 = vpop.xlane.xlu1 %1136  ;;  %v2944_v2 = vmov 0  }
 0x4ef   : > { %v1141_v5 = vmax.f32 %v1137_v3, 1e-24 }
 0x4f1   : > { %2473 = vrsqrt.f32 %v1141_v5 }
 0x4f7   : > { %v2470_v10 = vpop.eup %2469 }
 0x4f8   : > { %v2472_v11 = vpop.eup %2471  ;;  %v1147_v13 = vmul.f32 %v2470_v10, %v1114_v36 }
 0x4f9   : > { %v1148_v14 = vmul.f32 %v2472_v11, %v1117_v35  ;;  %v2121_v35 = vunpack.c.h.bf16 %v2119_v28 }
 0x4fa   : > { %v1151_v16 = vmul.f32 16.0, %v1147_v13 }
 0x4fb   : > { %v2474_v17 = vpop.eup %2473  ;;  %v1152_v20 = vmul.f32 16.0, %v1148_v14 }
 0x4fc   : > { %v1149_v18 = vmul.f32 %v2474_v17, %v1120_v41  ;;  %v1154_v19 = vpack.c.bf16 %v1151_v16, %v1150_v15 }
 0x4fe   : > { %v1153_v21 = vmul.f32 16.0, %v1149_v18  ;;  %2178 = vmatprep.mubr.msk.bf16.mxu1 %vm1005_vm3, %v1154_v19 }
 0x500   : > { %v1155_v22 = vpack.c.bf16 %v1153_v21, %v1152_v20 }
 0x502   : > { %2179 = vmatmul.mubr.msk.bf16.vlgmr.msra.gmra.mrb[4].mxu1 %vm1005_vm3, %v1155_v22  ;;  %v2437_v22 = vld [vmem:[%s3797_s23] sm:$0xff]  }
 0x5d5   : > { %v2180_v34 = vpop.f32.mrb[4].mxu1 }
 0x5d6   : > { %v1229_v36 = vadd.f32 %v2180_v34, %v2124_v31  ;;  %v1204_v37 = vpop.f32.mrb[5].mxu1 }
 0x5d7   : > { %v1227_v38 = vadd.f32 %v2120_v32, %v1204_v37  ;;  %v2181_v39 = vpop.f32.mrb[6].mxu1 }
 0x5d8   : > { %v1230_v40 = vadd.f32 %v2181_v39, %v2125_v33  ;;  %v1207_v41 = vpop.f32.mrb[7].mxu1  ;;  %v1242_v42 = vsel %vm1239_vm5, -1e+30, %v1229_v36 }
 0x5d9   : > { %v1228_v43 = vadd.f32 %v2121_v35, %v1207_v41  ;;  %v1251_v44 = vsel %vm1244_vm6, %v1242_v42, -inf  ;;  %v1240_v46 = vsel %vm1239_vm5, -1e+30, %v1227_v38  ;;  %v2439_v35 = vld [vmem:[%s3797_s23 + $0x10] sm:$0xff]   ;;  %v2440_v38 = vld [vmem:[%s3797_s23 + $0x18] sm:$0xff]  }
 0x5da   : > { %1252 = vmax.xlane.f32.xlu0 %v1251_v44  ;;  %v1243_v45 = vsel %vm1239_vm5, -1e+30, %v1230_v40  ;;  %v1245_v49 = vsel %vm1244_vm6, %v1240_v46, -inf }
 0x5db   : > { %v1254_v47 = vsel %vm1244_vm6, %v1243_v45, -inf  ;;  %v1241_v48 = vsel %vm1239_vm5, -1e+30, %v1228_v43 }
 0x5dc   : > { %1255 = vmax.xlane.f32.xlu1 %v1254_v47  ;;  %v1248_v50 = vsel %vm1244_vm6, %v1241_v48, -inf }
 0x5de   : > { %1246 = vmax.xlane.f32.xlu0 %v1245_v49 }
 0x5e0   : > { %1249 = vmax.xlane.f32.xlu1 %v1248_v50 }
 0x5f1   : > { %996 = vrot.lane.b32.xlu1 %v990_v4, %s2942_s2 }
 0x5f4   : > { %2429 = vrot.lane.b32.xlu0 %v3489_v8, %s2942_s2  ;;  %v1292_v8 = vsel %vm978_vm2, 65535, %v2944_v2  ;;  %s2945_s2 = smov [#allocation20]  }
 0x5f5   : > { %s2783_s14 = sshll.u32 %s2945_s2, 4  ;;  %s2784_s14 = int_to_ptr.vmem [resolvable:$false] %s2783_s14 }
 0x667   : > { %v1253_v51 = vpop.xlane.xlu0 %1252 }
 0x668   : > { %v1259_v54 = vsub.f32 %v1242_v42, %v1253_v51 }
 0x669   : > { %v1256_v52 = vpop.xlane.xlu1 %1255 }
 0x66a   : > { %v1260_v53 = vsub.f32 %v1243_v45, %v1256_v52  ;;  %v1265_v61 = vmul.f32 1.442695, %v1259_v54 }
 0x66b   : > { %v1247_v55 = vpop.xlane.xlu0 %1246 }
 0x66c   : > { %v1257_v56 = vsub.f32 %v1240_v46, %v1247_v55  ;;  %v1267_v57 = vmul.f32 1.442695, %v1260_v53 }
 0x66d   : > { %v1250_v58 = vpop.xlane.xlu1 %1249 }
 0x66e   : > { %v1261_v59 = vmul.f32 1.442695, %v1257_v56  ;;  %v1258_v60 = vsub.f32 %v1241_v48, %v1250_v58 }
 0x66f   : > { %v2430_v63 = vpop.permute.xlu0 %2429 }
 0x670   : > { %2475 = vpow2.f32 %v1261_v59  ;;  %v1263_v0 = vmul.f32 1.442695, %v1258_v60  ;;  %v2432_v1 = vunpack.i.h.bf16 %v2430_v63  ;;  %v2431_v4 = vunpack.i.l.bf16 %v2430_v63 }
 0x671   : > { %2477 = vpow2.f32 %v1267_v57  ;;  %v997_v3 = vpop.permute.xlu1 %996 }
 0x672   : > { %2479 = vpow2.f32 %v1263_v0  ;;  %v1001_v5 = vsel %vm978_vm2, %v986_v62, %v2431_v4  ;;  %v1284_v7 = vpack.c.bf16 %v997_v3, %v997_v3 }
 0x673   : > { %2481 = vpow2.f32 %v1265_v61  ;;  %v1283_v9 = vpack.c.bf16 %v2432_v1, %v1001_v5 }
 0x674   : > { %v1294_v10 = vand.u32 %v1292_v8, %v1284_v7 }
 0x675   : > { %2182 = vmatprep.subr.bf16.mxu1 %v1283_v9 }
 0x676   : > { %2183 = vmatpush3.bf16.msra.mxu1 %v1283_v9 }
 0x677   : > { %2184 = vmatprep.subr.bf16.mxu1 %v1294_v10 }
 0x67a   : > { %v2476_v11 = vpop.eup %2475  ;;  %2185 = vmatpush3.bf16.msra.mxu1 %v1294_v10 }
 0x67b   : > { %v2478_v13 = vpop.eup %2477  ;;  %v1269_v14 = vsel %vm1244_vm6, %v2476_v11, 0.0  ;;  %2190 = vmatprep.subr.bf16.mxu1 %v2937_v27 }
 0x67c   : > { %v2480_v15 = vpop.eup %2479  ;;  %1270 = vadd.xlane.f32.xlu1 %v1269_v14  ;;  %v1278_v20 = vsel %vm1244_vm6, %v2478_v13, 0.0 }
 0x67d   : > { %v2482_v16 = vpop.eup %2481  ;;  %v1272_v17 = vsel %vm1244_vm6, %v2480_v15, 0.0  ;;  %v1281_v18 = vpack.c.bf16 %v2480_v15, %v2476_v11 }
 0x67e   : > { %1273 = vadd.xlane.f32.xlu0 %v1272_v17  ;;  %v1282_v19 = vpack.c.bf16 %v2478_v13, %v2482_v16  ;;  %v1275_v21 = vsel %vm1244_vm6, %v2482_v16, 0.0  ;;  %v2096_v17 = vld [vmem:[#allocation10] ss:$0 sm:$0xff] }
 0x67f   : > { %2186 = vmatprep.mubr.msk.bf16.mxu1 %vm1244_vm6, %v1281_v18 }
 0x680   : > { %1279 = vadd.xlane.f32.xlu1 %v1278_v20  ;;  %2187 = vmatmul.mubr.msk.bf16.vlgmr.msra.gmra.mrb[8].mxu1 %vm1244_vm6, %v1282_v19 }
 0x681   : > { %2192 = vmatprep.mubr.msk.bf16.mxu1 %vm2938_vm1, %v2937_v27  ;;  %2191 = vmatpush3.bf16.msra.mxu1 %v2437_v22 }
 0x682   : > { %1276 = vadd.xlane.f32.xlu0 %v1275_v21  ;;  %2202 = vmatprep.subr.bf16.mxu1 %v2937_v27 }
 0x709   : > { %v1271_v23 = vpop.xlane.xlu1 %1270 }
 0x70a   : > { %2483 = vrcp.f32 %v1271_v23 }
 0x70b   : > { %v1274_v24 = vpop.xlane.xlu0 %1273 }
 0x70c   : > { %2485 = vrcp.f32 %v1274_v24 }
 0x70d   : > { %v1280_v26 = vpop.xlane.xlu1 %1279 }
 0x70f   : > { %v1277_v25 = vpop.xlane.xlu0 %1276 }
 0x710   : > { %2487 = vrcp.f32 %v1277_v25 }
 0x711   : > { %2489 = vrcp.f32 %v1280_v26  ;;  %v2443_v26 = vld [vmem:[#allocation18 + $0x4] ss:$8 sps:$4 sm:$0xff]  }
 0x714   : > { %v2484_v29 = vpop.eup %2483 }
 0x716   : > { %v2486_v33 = vpop.eup %2485 }
 0x71a   : > { %v2488_v40 = vpop.eup %2487 }
 0x71b   : > { %v2490_v42 = vpop.eup %2489 }
 0x753   : > { %v2188_v28 = vpop.f32.mrb[8].mxu1 }
 0x754   : > { %v1330_v30 = vpop.f32.mrb[9].mxu1  ;;  %v1351_v41 = vmul.f32 %v2488_v40, %v2188_v28  ;;  %v2441_v28 = vld [vmem:[#allocation18] ss:$8 sps:$4 sm:$0xff]  }
 0x755   : > { %v1349_v31 = vmul.f32 %v2484_v29, %v1330_v30  ;;  %v2189_v32 = vpop.f32.mrb[10].mxu1  ;;  %v2444_v29 = vld [vmem:[#allocation18 + $0x10] ss:$8 sps:$4 sm:$0xff]   ;;  %v2446_v30 = vld [vmem:[#allocation18 + $0x14] ss:$8 sps:$4 sm:$0xff]  }
 0x756   : > { %v1333_v34 = vpop.f32.mrb[11].mxu1  ;;  %v1352_v43 = vmul.f32 %v2490_v42, %v2189_v32  ;;  %v1355_v44 = vpack.c.bf16 %v1351_v41, %v1351_v41  ;;  %v2449_v40 = vld [vmem:[%s3800_s20 + $0x10] sm:$0xff]   ;;  %v2450_v41 = vld [vmem:[%s3800_s20 + $0x18] sm:$0xff]   ;;  %v2451_v42 = vld [vmem:[%s3800_s20 + $0x20] sm:$0xff]  }
 0x757   : > { %v1353_v36 = vpack.c.bf16 %v1349_v31, %v1349_v31  ;;  %v1350_v37 = vmul.f32 %v2486_v33, %v1333_v34  ;;  %v2097_v34 = vld [vmem:[%s3798_s30] ss:$0 sm:$0xff]  ;;  %s3628_s30 = scalar_lea.hbm %s3803_s22, %s2114_s7 }
 0x758   : > { %v1356_v45 = vpack.c.bf16 %v1352_v43, %v1352_v43  ;;  %v2452_v43 = vld [vmem:[%s3800_s20 + $0x28] sm:$0xff]  }
 0x759   : > { %v1354_v39 = vpack.c.bf16 %v1350_v37, %v1350_v37  ;;  %2193 = vmatmul.mubr.msk.bf16.vlgmr.msra.gmra.mrb[12].mxu1 %vm1005_vm3, %v1353_v36 }
 0x75a   : > { %2203 = vmatpush3.bf16.msra.mxu1 %v2439_v35  ;;  %2204 = vmatprep.mubr.msk.bf16.mxu1 %vm2938_vm1, %v2937_v27 }
 0x75b   : > { %2199 = vmatmul.mubr.msk.bf16.vlgmr.msra.gmra.mrb[4].mxu0 %vm1005_vm3, %v1354_v39  ;;  %1639 = vmatprep.subr.bf16.mxu1 %v2443_v26  ;;  %v2448_v39 = vld [vmem:[%s3800_s20 + $0x8] sm:$0xff]  }
 0x75c   : > { %2209 = vmatpush3.bf16.msra.mxu0 %v2440_v38  ;;  %2210 = vmatprep.mubr.msk.bf16.mxu0 %vm2938_vm1, %v2937_v27  ;;  %v2447_v38 = vld [vmem:[%s3799_s27] sm:$0xff]   ;;  %s3801_s27 = sld [smem:[#allocation29_spill]] }
 0x75d   : > { %2214 = vmatprep.subr.bf16.mxu0 %v2937_v27 }
 0x761   : > { %2205 = vmatmul.mubr.msk.bf16.vlgmr.msra.gmra.mrb[16].mxu1 %vm1005_vm3, %v1355_v44  ;;  %v2453_v44 = vld [vmem:[%s3800_s20 + $0x30] sm:$0xff]  }
 0x762   : > { %1671 = vmatprep.mubr.bf16.mxu1 %v2944_v2  ;;  %1640 = vmatpush1.bf16.msra.mxu1 %v2441_v28  ;;  %s831_s17 = sand.u32 1, %s3801_s27   ;;  %s2785_s27 = scalar_lea.vmem %s2784_s14, 256 }
 0x763   : > { %2211 = vmatmul.mubr.msk.bf16.vlgmr.msra.gmra.mrb[8].mxu0 %vm1005_vm3, %v1356_v45  ;;  %1641 = vmatprep.subr.bf16.mxu1 %v2446_v30  ;;  %v2454_v45 = vld [vmem:[%s3800_s20 + $0x38] sm:$0xff]   ;;  %s2071_s19 = sshll.u32 %s831_s17, 3  ;;  %s1796_s28 = scalar_lea.sflag [#allocation4], %s831_s17 }
 0x764   : > { %2230 = vmatprep.mubr.msk.bf16.mxu0 %vm2938_vm1, %v2937_v27  ;;  %2215 = vmatpush3.bf16.msra.mxu0 %v2447_v38  ;;  %s833_s0 = scalar_lea.vmem [#allocation20], %s2071_s19 }
 0x765   : > { %2216 = vmatprep.subr.bf16.mxu0 %v2937_v27  ;;  %s1811_s21 = sshll.u32 %s833_s0, 4  ;;  %s3630_s21 = int_to_ptr.vmem [resolvable:$true] %s1811_s21 }
 0x766   : > { %1642 = vmatpush1.bf16.msra.mxu1 %v2444_v29  ;;  %s2779_s26 = scalar_lea.vmem %s3630_s21, 128  ;;  %p2786_p12 = scmp.lt.s32.totalorder %s3630_s21, %s2784_s14 }
 0x767   : > { %p2780_p11 = scmp.ne.s32.totalorder %s3630_s21, %s2779_s26  ;;  %p2787_p7 = scmp.lt.s32.totalorder %s2785_s27, %s2779_s26 }
 0x768   : > { %2217 = vmatpush3.bf16.msra.mxu0 %v2448_v39 }
 0x769   : > { %2218 = vmatprep.subr.bf16.mxu0 %v2937_v27  ;;  %p2781_p6 = pnand %p2780_p11, %p3804_p1  ;;  %p2788_p8 = por %p2787_p7, %p2786_p12 }
 0x76b   : > { %p2782_p10 = pneg %p2781_p6 }
 0x76c   : > { %2219 = vmatpush3.bf16.msra.mxu0 %v2449_v40 }
 0x76d   : > { %2220 = vmatprep.subr.bf16.mxu0 %v2937_v27  ;;  %p2789_p3 = pnand %p2788_p8, %p2782_p10 }
 0x770   : > { %2221 = vmatpush3.bf16.msra.mxu0 %v2450_v41 }
 0x771   : > { %2222 = vmatprep.subr.bf16.mxu0 %v2937_v27 }
 0x774   : > { %2223 = vmatpush3.bf16.msra.mxu0 %v2451_v42 }
 0x775   : > { %2224 = vmatprep.subr.bf16.mxu0 %v2937_v27 }
 0x778   : > { %2225 = vmatpush3.bf16.msra.mxu0 %v2452_v43 }
 0x779   : > { %2226 = vmatprep.subr.bf16.mxu0 %v2937_v27 }
 0x77c   : > { %2227 = vmatpush3.bf16.msra.mxu0 %v2453_v44 }
 0x77d   : > { %2228 = vmatprep.subr.bf16.mxu0 %v2937_v27 }
 0x780   : > { %2229 = vmatpush3.bf16.msra.mxu0 %v2454_v45 }
 0x82c   : > { %v1408_v46 = vpop.f32.mrb[12].mxu1 }
 0x82d   : > { %v2194_v47 = vpop.f32.mrb[13].mxu1  ;;  %v1561_v50 = vsel %vm852_vm0, %v1408_v46, 0.0 }
 0x82e   : > { %v1411_v48 = vpop.f32.mrb[14].mxu1  ;;  %v1457_v49 = vpop.f32.mrb[4].mxu0 }
 0x82f   : > { %v1562_v51 = vsel %vm852_vm0, %v1457_v49, 0.0  ;;  %v2195_v52 = vpop.f32.mrb[15].mxu1  ;;  %v2200_v53 = vpop.f32.mrb[5].mxu0 }
 0x830   : > { %v1563_v54 = vadd.f32 %v1562_v51, %v1561_v50  ;;  %v1460_v55 = vpop.f32.mrb[6].mxu0 }
 0x831   : > { %v2201_v56 = vpop.f32.mrb[7].mxu0 }
 0x834   : > { %v1506_v57 = vpop.f32.mrb[16].mxu1 }
 0x835   : > { %v1564_v58 = vsel %vm852_vm0, %v1506_v57, 0.0  ;;  %v2206_v59 = vpop.f32.mrb[17].mxu1 }
 0x836   : > { %v1565_v60 = vadd.f32 %v1564_v58, %v1563_v54  ;;  %v1509_v61 = vpop.f32.mrb[18].mxu1  ;;  %v1555_v62 = vpop.f32.mrb[8].mxu0 }
 0x837   : > { %v1566_v63 = vsel %vm852_vm0, %v1555_v62, 0.0  ;;  %v2207_v0 = vpop.f32.mrb[19].mxu1  ;;  %v2212_v1 = vpop.f32.mrb[9].mxu0 }
 0x838   : > { %v1567_v4 = vadd.f32 %v1566_v63, %v1565_v60  ;;  %v1558_v2 = vpop.f32.mrb[10].mxu0 }
 0x839   : > { %v2213_v8 = vpop.f32.mrb[11].mxu0 }
 0x83a   : > { %v1569_v3 = vsel %vm852_vm0, %v1567_v4, 0.0 }
 0x83b   : > { %1570 = vadd.xlane.f32.xlu0 %v1569_v3 }
 0x8c8   : > { %v1571_v5 = vpop.xlane.xlu0 %1570 }
 0x8c9   : > { %v1572_v7 = vmul.f32 0.03125, %v1571_v5 }
 0x8cb   : > { %v1573_v9 = vsub.f32 %v1567_v4, %v1572_v7 }
 0x8cd   : > { %v1574_v10 = vmul.f32 %v1573_v9, %v1573_v9 }
 0x8cf   : > { %v1575_v11 = vsel %vm852_vm0, %v1574_v10, 0.0 }
 0x8d0   : > { %1576 = vadd.xlane.f32.xlu1 %v1575_v11 }
 0x95d   : > { %v1577_v13 = vpop.xlane.xlu1 %1576 }
 0x95e   : > { %v1578_v14 = vmul.f32 0.03125, %v1577_v13 }
 0x960   : > { %v1579_v15 = vadd.f32 1e-05, %v1578_v14 }
 0x962   : > { %2491 = vrsqrt.f32 %v1579_v15 }
 0x96c   : > { %v2492_v16 = vpop.eup %2491 }
 0x96d   : > { %v1581_v18 = vmul.f32 %v2492_v16, %v1573_v9 }
 0x96f   : > { %v1588_v19 = vmul.f32 %v2096_v17, %v1581_v18 }
 0x971   : > { %v3580_v20 = vadd.f32 %v1588_v19, %v3452_v6 }
 0x973   : > { %v1591_v21 = vsel %vm852_vm0, %v3580_v20, 0.0 }
 0x974   : > { %1592 = vadd.xlane.f32.xlu0 %v1591_v21 }
 0xa01   : > { %v1593_v22 = vpop.xlane.xlu0 %1592 }
 0xa02   : > { %v1594_v12 = vmul.f32 0.03125, %v1593_v22 }
 0xa04   : > { %v1595_v23 = vsub.f32 %v3580_v20, %v1594_v12 }
 0xa06   : > { %v1596_v24 = vmul.f32 %v1595_v23, %v1595_v23 }
 0xa08   : > { %v1597_v25 = vsel %vm852_vm0, %v1596_v24, 0.0 }
 0xa09   : > { %1598 = vadd.xlane.f32.xlu1 %v1597_v25 }
 0xa96   : > { %v1599_v6 = vpop.xlane.xlu1 %1598 }
 0xa97   : > { %v1600_v31 = vmul.f32 0.03125, %v1599_v6 }
 0xa99   : > { %v1601_v32 = vadd.f32 1e-05, %v1600_v31 }
 0xa9b   : > { %2493 = vrsqrt.f32 %v1601_v32 }
 0xaa5   : > { %v2494_v33 = vpop.eup %2493 }
 0xaa6   : > { %v1603_v35 = vmul.f32 %v2494_v33, %v1595_v23 }
 0xaa8   : > { %v1610_v36 = vmul.f32 %v2097_v34, %v1603_v35 }
 0xaaa   : > { %v1611_v37 = vpack.c.bf16 %v1610_v36, %v1610_v36 }
 0xaac   : > { %2102 = vmatmul.mubr.msk.bf16.vlgmr.msra.gmra.mrb[20].mxu1 %vm852_vm0, %v1611_v37 }
 0xb7f   : > { %v1673_v46 = vpop.f32.mrb[20].mxu1 }
 0xb80   : > { %v1675_v47 = vpop.f32.mrb[21].mxu1 }
 0xb81   : > { %v2103_v48 = vmul.f32 -1.442695, %v1675_v47  ;;  %v1677_v49 = vpop.f32.mrb[22].mxu1 }
 0xb82   : > { %v1678_v50 = vpop.f32.mrb[23].mxu1 }
 0xb83   : > { %2495 = vpow2.f32 %v2103_v48 }
 0xb8d   : > { %v2496_v51 = vpop.eup %2495 }
 0xb8e   : > { %v1683_v52 = vadd.f32 1.0, %v2496_v51 }
 0xb90   : > { %2497 = vrcp.f32 %v1683_v52 }
 0xb9a   : > { %v2498_v53 = vpop.eup %2497 }
 0xb9b   : > { %v1686_v54 = vmul.f32 %v2498_v53, %v1675_v47 }
 0xb9d   : > { %v1687_v27 = vmul.f32 %v1686_v54, %v1673_v46 }
 0xb9f   : > { %v1688_v55 = vpack.c.bf16 %v1687_v27, %v1687_v27 }
 0xba1   : > { %2231 = vmatmul.mubr.bf16.vlgmr.msra.gmra.mrb[12].mxu0 %v1688_v55 }
 0xc74   : > { %v1787_v56 = vpop.f32.mrb[12].mxu0 }
 0xc75   : > { %v1793_v57 = vadd.f32 %v1787_v56, %v3580_v20  ;;  %v2232_v58 = vpop.f32.mrb[13].mxu0 }
 0xc76   : > { %v1790_v59 = vpop.f32.mrb[14].mxu0 }
 0xc77   : > { %v2233_v60 = vpop.f32.mrb[15].mxu0  ;;  %1794 = vst.msk [vmem:[%s833_s0] sm:$0xff] %vm852_vm0, %v1793_v57 }
 0xc78   : > { %2792 = shalt.err (!%p2789_p3)
}
 0xc79   : > { %s2793_s17 = scalar_lea.hbm %s3628_s30, 128  ;;  %s2797_s6 = scalar_lea.hbm %s3803_s22, 512 }
 0xc7a   : > { %p2794_p9 = scmp.ne.s32.totalorder %s3628_s30, %s2793_s17  ;;  %p2798_p13 = scmp.lt.u32.totalorder %s3628_s30, %s3803_s22 }
 0xc7b   : > { %p2799_p4 = scmp.lt.u32.totalorder %s2797_s6, %s2793_s17  ;;  %p2801_p11 = scmp.lt.u32.totalorder %s2793_s17, %s3628_s30 }
 0xc7c   : > { %p2795_p5 = pnand %p2794_p9, %p3804_p1 }
 0xc7d   : > { %p2800_p2 = por %p2799_p4, %p2798_p13 }
 0xc7e   : > { %p2796_p0 = pneg %p2795_p5 }
 0xc7f   : > { %p2802_p6 = por %p2801_p11, %p2800_p2 }
 0xc81   : > { %p2803_p10 = pnand %p2802_p6, %p2796_p0 }
 0xc83   : > { %2806 = shalt.err (!%p2803_p10)
}
 0xc84   : > { %2272 = dma.vmem_to_hbm [thread:$0]  (%p3804_p1), %s3630_s21, 128, %s3628_s30, %s1796_s28  }
 0xc85 PF: > { %s3805_s4 = sld [smem:[#allocation28_spill]]  ;;  %s3806_s25 = sld [smem:[#allocation42_spill]] }
 0xc86   : > { %p2319_p12 = scmp.ge.s32.totalorder %s2921_s1, 2 }
 0xc8b   : > { %s1823_s26 = sand.u32 1, %s3805_s4   ;;  %p3807_p7 = scmp.ne.s32.totalorder %s3806_s25, 0 }
 0xc8c   : > { %s1824_s2 = scalar_lea.sflag [#allocation4], %s1823_s26 }
 0xc8d   : > { %p2300_p8 = pnand %p2319_p12, %p3807_p7 }
 0xc8f   : > { %2876 = dma.done.wait (!%p2300_p8), %s1824_s2, 128  }
 0xc90   : > { %2878 = vsyncadd (!%p2300_p8), %s1824_s2, 4294967168  ;;  %s38_s1 = sadd.s32 1, %s2921_s1   ;;  %s3808_s24 = sld [smem:[#allocation29_spill]] }
 0xc91   : > { %p35_p3 = scmp.ge.s32.totalorder %s38_s1, 6   ;;  %s3809_s25 = sld [smem:[#allocation30_spill]] }
 0xc92   : > { %s3810_s26 = sld [smem:[#allocation40_spill]]  ;;  %s3811_s27 = sld [smem:[#allocation31_spill]] }
 0xc93   : > { %s3812_s16 = sld [smem:[#allocation38_spill]]  ;;  %s3813_s30 = sld [smem:[#allocation34_spill]] }
 0xc94   : > { %s3814_s21 = sld [smem:[#allocation36_spill]]  ;;  %s3815_s19 = sld [smem:[#allocation37_spill]] }
 0xc95   : > { %s3816_s28 = smov %s2901_s29  ;;  %s3818_s0 = smov %s2913_s18 }
 0xc96   :  { %37 = sbr.rel (!%p35_p3) target bundleno = 24 (0x18), region = 232 }
 0xc99   : > { %s3817_s29 = smov %s3812_s16 }
 0xc9a   : > { %s3819_s18 = smov %s3814_s21 }
 0xc9d   :  { %1829 = vsyncpa [#allocation3], 1 }
 0xc9e   :  { %1831 = vsyncpa [#allocation3 + $0x1], 1 }
 0xc9f   :  { %1832 = vsyncpa [#allocation6], 1 }
 0xca0   :  { %1833 = vsyncpa [#allocation9], 1 }
 0xca1   :  { %1834 = vsyncpa [#allocation12], 1 }
 0xca2   :  { %1836 = vsyncpa [#allocation12 + $0x1], 1 }
 0xca3   :  { %1837 = vsyncpa [#allocation15], 1 }
 0xca4   :  { %1838 = vsyncpa [#allocation19], 1 }
 0xca5   :  { %1839 = vsyncpa [#allocation4], 1 }
 0xca6   :  { %1841 = vsyncpa [#allocation4 + $0x1], 1 }

</bundles_post_ra>
